<compile_context>
chip_gen: v7x
topology: tpu7x:2x2x1
jax: 0.10.0
libtpu: 0.0.40
codegen_flags: <defaults>
</compile_context>

<pallas_src>
import math
import numpy as np
import jax
import jax.numpy as jnp
from jax.experimental import pallas as pl
from jax.experimental.pallas import tpu as pltpu

# ----------------------------- config (cfg) ----------------------------------
TIMESTEPS = 1000
OBJECTIVE = "pred_noise"
BETA_SCHEDULE = "cosine"
SNR_CLIP = 5.0
CUM_SNR_DECAY = 0.96
CLIP_NOISE = 20.0
USE_FUSED_SNR = True

# ----------------------------- shapes -----------------------------------------
F_FRAMES, B, C, H, W = 8, 2, 4, 16, 16
N = F_FRAMES * B          # kernel rows
D = C * H * W             # kernel lanes (flattened CHW)
E = 32                    # time-embedding dim
TN = 512                  # weight / output column tile (multiple of 128)


# ----------------------------- beta schedule (buffers) ------------------------
def cosine_beta_schedule(timesteps, s=0.008):
    steps = timesteps + 1
    t = np.linspace(0, timesteps, steps, dtype=np.float64) / timesteps
    alphas_cumprod = np.cos((t + s) / (1 + s) * math.pi * 0.5) ** 2
    alphas_cumprod = alphas_cumprod / alphas_cumprod[0]
    betas = 1.0 - (alphas_cumprod[1:] / alphas_cumprod[:-1])
    return np.clip(betas, 0.0, 0.999)


def build_buffers(timesteps):
    betas = cosine_beta_schedule(timesteps)
    alphas = 1.0 - betas
    alphas_cumprod = np.cumprod(alphas, axis=0)
    buf = dict(
        sqrt_alphas_cumprod=np.sqrt(alphas_cumprod),
        sqrt_one_minus_alphas_cumprod=np.sqrt(1.0 - alphas_cumprod),
        sqrt_recip_alphas_cumprod=np.sqrt(1.0 / alphas_cumprod),
        sqrt_recipm1_alphas_cumprod=np.sqrt(1.0 / alphas_cumprod - 1.0),
        snr=alphas_cumprod / (1.0 - alphas_cumprod),
    )
    buf["clipped_snr"] = np.clip(buf["snr"], a_min=None, a_max=SNR_CLIP)
    return {k: jnp.asarray(v, dtype=jnp.float32) for k, v in buf.items()}


BUFFERS = build_buffers(TIMESTEPS)


# ----------------------------- loss weights (fused SNR) -----------------------
def compute_loss_weights(noise_levels):
    # noise_levels: (F, B) int32 -> weights (F, B) float32
    snr = BUFFERS["snr"][noise_levels]
    clipped_snr = BUFFERS["clipped_snr"][noise_levels]
    normalized_clipped_snr = clipped_snr / SNR_CLIP
    normalized_snr = snr / SNR_CLIP
    if not USE_FUSED_SNR:
        return clipped_snr / snr  # pred_noise branch

    # recursive cumulative SNR over the frame axis (tiny: F steps), glue-level JAX
    cum_rows = []
    prev = jnp.zeros((noise_levels.shape[1],), dtype=jnp.float32)
    for t in range(noise_levels.shape[0]):
        if t == 0:
            prev = normalized_clipped_snr[0]
        else:
            prev = CUM_SNR_DECAY * prev + (1.0 - CUM_SNR_DECAY) * normalized_clipped_snr[t]
        cum_rows.append(prev)
    cum_snr = jnp.stack(cum_rows, axis=0)
    # F.pad(cum_snr[:-1], (0,0,1,0)) : shift frames down by one, zero at frame 0
    cum_snr = jnp.concatenate(
        [jnp.zeros((1, noise_levels.shape[1]), jnp.float32), cum_snr[:-1]], axis=0)
    clipped_fused = 1.0 - (1.0 - cum_snr * CUM_SNR_DECAY) * (1.0 - normalized_clipped_snr)
    fused = 1.0 - (1.0 - cum_snr * CUM_SNR_DECAY) * (1.0 - normalized_snr)
    return clipped_fused / fused  # objective == 'pred_noise'


# ----------------------------- Pallas kernel ----------------------------------
def diffusion_fwd_kernel(x_ref, noise_ref, w_ref, bias_ref, coef_ref,
                         xpred_ref, loss_ref):
    # Grid axis j walks output-column tiles of the weight ("parallel" on v7x).
    j = pl.program_id(0)
    tn = xpred_ref.shape[1]

    # packed per-row coefficients: [sa, s1ma, sr, srm1, lw, pad, pad, pad]
    sa = coef_ref[:, 0:1]
    s1ma = coef_ref[:, 1:2]
    sr = coef_ref[:, 2:3]
    srm1 = coef_ref[:, 3:4]
    lw = coef_ref[:, 4:5]

    # q_sample over the full row is needed for the K-contraction of the matmul.
    # Elementwise math stays f32 on the VPU; only the MXU operands are bf16.
    noised_full = sa * x_ref[...] + s1ma * noise_ref[...]            # (N, D) f32

    # stand-in denoiser: bf16 MXU matmul against this weight column tile,
    # f32 accumulate, plus the (precomputed) time-embedding bias tile.
    model_out = jnp.dot(noised_full.astype(jnp.bfloat16), w_ref[...],
                        preferred_element_type=jnp.float32) + bias_ref[...]

    # per-column epilogue (f32 VPU) on the resident x / noise slices
    col = pl.ds(pl.multiple_of(j * tn, 128), tn)
    x_c = x_ref[:, col]
    noise_c = noise_ref[:, col]
    noised_c = sa * x_c + s1ma * noise_c

    # objective == 'pred_noise'
    pred_noise = jnp.clip(model_out, -CLIP_NOISE, CLIP_NOISE)
    x_start = sr * noised_c - srm1 * pred_noise      # predict_start_from_noise

    # mse loss vs. (pre-clipped) noise target, scaled by per-(frame,batch) weight
    diff = model_out - noise_c
    loss = diff * diff * lw

    xpred_ref[...] = x_start
    loss_ref[...] = loss


def diffusion_forward(x, noise_levels, model_w, model_wt, key):
    """x: (F,B,C,H,W) f32, noise_levels: (F,B) int32 -> (x_pred, loss) same shape as x."""
    f, b, c, h, w = x.shape
    n, d = f * b, c * h * w

    noise = jax.random.normal(key, x.shape, dtype=jnp.float32)
    noise = jnp.clip(noise, -CLIP_NOISE, CLIP_NOISE)

    t_flat = noise_levels.reshape(n)                               # (N,)
    lw = compute_loss_weights(noise_levels).reshape(n)

    # pack the five per-row coefficients into a single (N, 8) input
    coef = jnp.stack(
        [
            BUFFERS["sqrt_alphas_cumprod"][t_flat],
            BUFFERS["sqrt_one_minus_alphas_cumprod"][t_flat],
            BUFFERS["sqrt_recip_alphas_cumprod"][t_flat],
            BUFFERS["sqrt_recipm1_alphas_cumprod"][t_flat],
            lw,
            jnp.zeros((n,), jnp.float32),
            jnp.zeros((n,), jnp.float32),
            jnp.zeros((n,), jnp.float32),
        ],
        axis=1,
    )                                                              # (N, 8)

    # sinusoidal time embedding and its tiny (K=E) projection, precomputed as an
    # (N, D) bias so the kernel runs a single fused MXU matmul per column tile.
    half = E // 2
    freqs = jnp.exp(-math.log(10000.0) * jnp.arange(half, dtype=jnp.float32) / half)
    ang = t_flat.astype(jnp.float32)[:, None] * freqs[None, :]
    temb = jnp.concatenate([jnp.sin(ang), jnp.cos(ang)], axis=-1)  # (N, E)
    temb_bias = jnp.dot(temb, model_wt)                            # (N, D) f32

    # bf16 weight: halves the dominant HBM stream, native MXU bf16 path
    w_bf16 = model_w.astype(jnp.bfloat16)                          # (D, D) bf16

    x2 = x.reshape(n, d)
    noise2 = noise.reshape(n, d)

    num_tiles = d // TN
    x_pred2, loss2 = pl.pallas_call(
        diffusion_fwd_kernel,
        out_shape=(jax.ShapeDtypeStruct((n, d), jnp.float32),
                   jax.ShapeDtypeStruct((n, d), jnp.float32)),
        grid=(num_tiles,),
        in_specs=[
            pl.BlockSpec((n, d), lambda j: (0, 0)),        # x        (resident)
            pl.BlockSpec((n, d), lambda j: (0, 0)),        # noise    (resident)
            pl.BlockSpec((d, TN), lambda j: (0, j)),       # weight   (streamed tiles)
            pl.BlockSpec((n, TN), lambda j: (0, j)),       # temb bias (streamed tiles)
            pl.BlockSpec((n, 8), lambda j: (0, 0)),        # packed coefficients
        ],
        out_specs=(pl.BlockSpec((n, TN), lambda j: (0, j)),
                   pl.BlockSpec((n, TN), lambda j: (0, j))),
        compiler_params=pltpu.CompilerParams(
            dimension_semantics=("parallel",)),
    )(x2, noise2, w_bf16, temb_bias, coef)

    return x_pred2.reshape(f, b, c, h, w), loss2.reshape(f, b, c, h, w)


diffusion_forward_jit = jax.jit(diffusion_forward)


# ----------------------------- main --------------------------------------------
if __name__ == "__main__":
    key = jax.random.PRNGKey(0)
    k_x, k_t, k_w, k_wt, k_noise = jax.random.split(key, 5)

    x = jax.random.normal(k_x, (F_FRAMES, B, C, H, W), dtype=jnp.float32)
    noise_levels = jax.random.randint(k_t, (F_FRAMES, B), 0, TIMESTEPS, dtype=jnp.int32)

    # deterministic stand-in model parameters
    model_w = 0.02 * jax.random.normal(k_w, (D, D), dtype=jnp.float32)
    model_wt = 0.02 * jax.random.normal(k_wt, (E, D), dtype=jnp.float32)

    x_pred, loss = diffusion_forward_jit(x, noise_levels, model_w, model_wt, k_noise)
    jax.block_until_ready((x_pred, loss))

    assert x_pred.shape == (F_FRAMES, B, C, H, W)
    assert loss.shape == (F_FRAMES, B, C, H, W)
    assert bool(jnp.all(jnp.isfinite(x_pred))) and bool(jnp.all(jnp.isfinite(loss)))
    print("KERNEL_OK")
</pallas_src>

<mosaic_0001>
module attributes {stable_mosaic.version = 11 : i64} {
  func.func @diffusion_fwd_kernel(%arg0: i32, %arg1: memref<16x1024xf32, #tpu.memory_space<vmem>>, %arg2: memref<16x1024xf32, #tpu.memory_space<vmem>>, %arg3: memref<1024x512xbf16, #tpu.memory_space<vmem>>, %arg4: memref<16x512xf32, #tpu.memory_space<vmem>>, %arg5: memref<16x8xf32, #tpu.memory_space<vmem>>, %arg6: memref<16x512xf32, #tpu.memory_space<vmem>>, %arg7: memref<16x512xf32, #tpu.memory_space<vmem>>) attributes {dimension_semantics = [#tpu.dimension_semantics<parallel>], iteration_bounds = array<i64: 2>, scalar_prefetch = 0 : i64, scratch_operands = 0 : i64, tpu.core_type = #tpu.core_type<tc>, window_params = [{pipeline_mode = #tpu.pipeline_mode<synchronous>, transform_indices = @transform_0, window_bounds = array<i64: 16, 1024>}, {pipeline_mode = #tpu.pipeline_mode<synchronous>, transform_indices = @transform_1, window_bounds = array<i64: 16, 1024>}, {transform_indices = @transform_2, window_bounds = array<i64: 1024, 512>}, {transform_indices = @transform_3, window_bounds = array<i64: 16, 512>}, {pipeline_mode = #tpu.pipeline_mode<synchronous>, transform_indices = @transform_4, window_bounds = array<i64: 16, 8>}, {transform_indices = @transform_5, window_bounds = array<i64: 16, 512>}, {transform_indices = @transform_6, window_bounds = array<i64: 16, 512>}]} {
    %c0 = arith.constant 0 : index
    %c0_0 = arith.constant 0 : index
    %0 = vector.load %arg5[%c0, %c0_0] : memref<16x8xf32, #tpu.memory_space<vmem>>, vector<16x1xf32>
    %c0_1 = arith.constant 0 : index
    %c1 = arith.constant 1 : index
    %1 = vector.load %arg5[%c0_1, %c1] : memref<16x8xf32, #tpu.memory_space<vmem>>, vector<16x1xf32>
    %c0_2 = arith.constant 0 : index
    %c2 = arith.constant 2 : index
    %2 = vector.load %arg5[%c0_2, %c2] : memref<16x8xf32, #tpu.memory_space<vmem>>, vector<16x1xf32>
    %c0_3 = arith.constant 0 : index
    %c3 = arith.constant 3 : index
    %3 = vector.load %arg5[%c0_3, %c3] : memref<16x8xf32, #tpu.memory_space<vmem>>, vector<16x1xf32>
    %c0_4 = arith.constant 0 : index
    %c4 = arith.constant 4 : index
    %4 = vector.load %arg5[%c0_4, %c4] : memref<16x8xf32, #tpu.memory_space<vmem>>, vector<16x1xf32>
    %c0_5 = arith.constant 0 : index
    %c0_6 = arith.constant 0 : index
    %5 = vector.load %arg1[%c0_5, %c0_6] : memref<16x1024xf32, #tpu.memory_space<vmem>>, vector<16x1024xf32>
    %6 = vector.broadcast %0 : vector<16x1xf32> to vector<16x1024xf32>
    %7 = arith.mulf %6, %5 : vector<16x1024xf32>
    %c0_7 = arith.constant 0 : index
    %c0_8 = arith.constant 0 : index
    %8 = vector.load %arg2[%c0_7, %c0_8] : memref<16x1024xf32, #tpu.memory_space<vmem>>, vector<16x1024xf32>
    %9 = vector.broadcast %1 : vector<16x1xf32> to vector<16x1024xf32>
    %10 = arith.mulf %9, %8 : vector<16x1024xf32>
    %11 = arith.addf %7, %10 : vector<16x1024xf32>
    %12 = arith.truncf %11 : vector<16x1024xf32> to vector<16x1024xbf16>
    %c0_9 = arith.constant 0 : index
    %c0_10 = arith.constant 0 : index
    %13 = vector.load %arg3[%c0_9, %c0_10] : memref<1024x512xbf16, #tpu.memory_space<vmem>>, vector<1024x512xbf16>
    %cst = arith.constant dense<0.000000e+00> : vector<16x512xf32>
    %14 = tpu.matmul %12, %13, %cst {dimension_numbers = #tpu.dot_dimension_numbers<[1], [0], [0], [1], [0, 0, 1, 1], [], []>} : vector<16x1024xbf16>, vector<1024x512xbf16>, vector<16x512xf32> -> vector<16x512xf32>
    %c0_11 = arith.constant 0 : index
    %c0_12 = arith.constant 0 : index
    %15 = vector.load %arg4[%c0_11, %c0_12] : memref<16x512xf32, #tpu.memory_space<vmem>>, vector<16x512xf32>
    %16 = arith.addf %14, %15 : vector<16x512xf32>
    %c512_i32 = arith.constant 512 : i32
    %17 = arith.muli %arg0, %c512_i32 : i32
    %18 = tpu.assume_multiple %17, 128 : i32
    %c0_13 = arith.constant 0 : index
    %19 = arith.index_cast %18 : i32 to index
    %20 = vector.load %arg1[%c0_13, %19] : memref<16x1024xf32, #tpu.memory_space<vmem>>, vector<16x512xf32>
    %c0_14 = arith.constant 0 : index
    %21 = arith.index_cast %18 : i32 to index
    %22 = vector.load %arg2[%c0_14, %21] : memref<16x1024xf32, #tpu.memory_space<vmem>>, vector<16x512xf32>
    %23 = vector.broadcast %0 : vector<16x1xf32> to vector<16x512xf32>
    %24 = arith.mulf %23, %20 : vector<16x512xf32>
    %25 = vector.broadcast %1 : vector<16x1xf32> to vector<16x512xf32>
    %26 = arith.mulf %25, %22 : vector<16x512xf32>
    %27 = arith.addf %24, %26 : vector<16x512xf32>
    %cst_15 = arith.constant -2.000000e+01 : f32
    %cst_16 = arith.constant 2.000000e+01 : f32
    %28 = vector.broadcast %cst_15 : f32 to vector<16x512xf32>
    %29 = arith.maximumf %28, %16 : vector<16x512xf32>
    %30 = vector.broadcast %cst_16 : f32 to vector<16x512xf32>
    %31 = arith.minimumf %30, %29 : vector<16x512xf32>
    %32 = vector.broadcast %2 : vector<16x1xf32> to vector<16x512xf32>
    %33 = arith.mulf %32, %27 : vector<16x512xf32>
    %34 = vector.broadcast %3 : vector<16x1xf32> to vector<16x512xf32>
    %35 = arith.mulf %34, %31 : vector<16x512xf32>
    %36 = arith.subf %33, %35 : vector<16x512xf32>
    %37 = arith.subf %16, %22 : vector<16x512xf32>
    %38 = arith.mulf %37, %37 : vector<16x512xf32>
    %39 = vector.broadcast %4 : vector<16x1xf32> to vector<16x512xf32>
    %40 = arith.mulf %38, %39 : vector<16x512xf32>
    %c0_17 = arith.constant 0 : index
    %c0_18 = arith.constant 0 : index
    %41 = vector.load %arg6[%c0_17, %c0_18] : memref<16x512xf32, #tpu.memory_space<vmem>>, vector<16x512xf32>
    tpu.vector_store %arg6[%c0_17, %c0_18], %36 {strides = array<i32>} : memref<16x512xf32, #tpu.memory_space<vmem>>, vector<16x512xf32>,
    %c0_19 = arith.constant 0 : index
    %c0_20 = arith.constant 0 : index
    %42 = vector.load %arg7[%c0_19, %c0_20] : memref<16x512xf32, #tpu.memory_space<vmem>>, vector<16x512xf32>
    tpu.vector_store %arg7[%c0_19, %c0_20], %40 {strides = array<i32>} : memref<16x512xf32, #tpu.memory_space<vmem>>, vector<16x512xf32>,
    return
  }
  func.func @transform_0(%arg0: i32) -> (i32, i32) {
    %c0_i32 = arith.constant 0 : i32
    %c0_i32_0 = arith.constant 0 : i32
    %c0_i32_1 = arith.constant 0 : i32
    return %c0_i32, %c0_i32_0 : i32, i32
  }
  func.func @transform_1(%arg0: i32) -> (i32, i32) {
    %c0_i32 = arith.constant 0 : i32
    %c0_i32_0 = arith.constant 0 : i32
    %c0_i32_1 = arith.constant 0 : i32
    return %c0_i32, %c0_i32_0 : i32, i32
  }
  func.func @transform_2(%arg0: i32) -> (i32, i32) {
    %c0_i32 = arith.constant 0 : i32
    %c0_i32_0 = arith.constant 0 : i32
    return %c0_i32, %arg0 : i32, i32
  }
  func.func @transform_3(%arg0: i32) -> (i32, i32) {
    %c0_i32 = arith.constant 0 : i32
    %c0_i32_0 = arith.constant 0 : i32
    return %c0_i32, %arg0 : i32, i32
  }
  func.func @transform_4(%arg0: i32) -> (i32, i32) {
    %c0_i32 = arith.constant 0 : i32
    %c0_i32_0 = arith.constant 0 : i32
    %c0_i32_1 = arith.constant 0 : i32
    return %c0_i32, %c0_i32_0 : i32, i32
  }
  func.func @transform_5(%arg0: i32) -> (i32, i32) {
    %c0_i32 = arith.constant 0 : i32
    %c0_i32_0 = arith.constant 0 : i32
    return %c0_i32, %arg0 : i32, i32
  }
  func.func @transform_6(%arg0: i32) -> (i32, i32) {
    %c0_i32 = arith.constant 0 : i32
    %c0_i32_0 = arith.constant 0 : i32
    return %c0_i32, %arg0 : i32, i32
  }
}

</mosaic_0001>

<bundles_post_ra>
// kernel: diffusion_forward.1
= control target key start
LH: loop header
LB: loop body
LE: loop exit
PB: predicated region body
PF: predicated region fallthrough
CT: control target
= control target key end

     0   :  { %s3989_s21 = smov 0   ;;  %s3991_s22 = smov 0   ;;  %s5170_s0 = inlined_call_operand.vmem [shape: f32[16,1024], index: 0, kind: input, shape index: {}]   ;;  %s5171_s1 = inlined_call_operand.vmem [shape: f32[16,1024], index: 1, kind: input, shape index: {}]   ;;  %s5172_s2 = inlined_call_operand.vmem [shape: bf16[1024,1024], index: 2, kind: input, shape index: {}]   ;;  %s5173_s3 = inlined_call_operand.vmem [shape: f32[16,1024], index: 3, kind: input, shape index: {}]   ;;  %s5174_s4 = inlined_call_operand.vmem [shape: f32[16,8], index: 4, kind: input, shape index: {}]   ;;  %s5175_s5 = inlined_call_operand.vmem [shape: f32[16,1024], index: 5, kind: output, shape index: {0}]   ;;  %s5176_s6 = inlined_call_operand.vmem [shape: f32[16,1024], index: 6, kind: output, shape index: {1}]  }
   0x1   :  { %s3993_s23 = smov 0  }
   0x2 LB: > { %s4005_s24 = sadd.s32 4294967295, %s3947_s23   ;;  %s4008_s25 = sadd.s32 1, %s3947_s23   ;;  %s3947_s23 = sphi %s3993_s23, %s5181_s23   ;;  %s3943_s22 = sphi %s3991_s22, %s5180_s22   ;;  %s3939_s21 = sphi %s3989_s21, %s5179_s21  }
   0x3   : > { %s63_s26 = ssub.s32 %s3947_s23, %s4008_s25  ;;  %s66_s27 = sadd.s32 1, %s3943_s22 }
   0x4   : > { %p64_p0 = scmp.eq.s32.totalorder %s63_s26, 0  ;;  %p73_p1 = scmp.ne.s32.totalorder %s3943_s22, %s3939_s21 }
   0x5   : > { %p74_p2 = scmp.eq.s32.totalorder %s3947_s23, 0  ;;  %p150_p3 = scmp.eq.s32.totalorder %s4005_s24, 1 }
   0x6   : > { %s4018_s28 = scalar_select %p64_p0, %s3943_s22, %s66_s27  }
   0x7   : > { %p4020_p4 = por %p74_p2, %p73_p1  ;;  %p4024_p5 = por %p150_p3, %p73_p1 }
   0x8   : > { %p3179_p6 = scmp.ge.s32.totalorder %s3947_s23, 2 }
   0xa   : > { %207 = sbr.rel (%p3179_p6) target bundleno = 157 (0x9d), region = 28 }
  0x11   : > { %210 = sbr.rel (!%p4020_p4) target bundleno = 149 (0x95), region = 32  ;;  %s212_s7 = sand.u32 (%p4020_p4), 1, %s3943_s22  }
  0x12   : > { %s3466_s8 = sshll.u32 (%p4020_p4), %s3947_s23, 4  ;;  %s3180_s9 = sshll.u32 (%p4020_p4), %s212_s7, 11 }
  0x13   : > { %s4036_s12 = scalar_lea.vmem (%p4020_p4), %s5172_s2, %s3466_s8  ;;  %s4041_s13 = scalar_lea.vmem (%p4020_p4), [#allocation2], %s3180_s9 }
  0x14   : > { %v230_v0 = vld [vmem:[%s4036_s12] sm:$0xff] (%p4020_p4)  ;;  %v232_v1 = vld [vmem:[%s4036_s12 + $0x8] sm:$0xff] (%p4020_p4) }
  0x15   : > { %v234_v2 = vld [vmem:[%s4036_s12 + $0x20] sm:$0xff] (%p4020_p4)  ;;  %231 = vst [vmem:[%s4041_s13] sm:$0xff] (%p4020_p4), %v230_v0  ;;  %233 = vst [vmem:[%s4041_s13 + $0x8] sm:$0xff] (%p4020_p4), %v232_v1  ;;  %v236_v3 = vld [vmem:[%s4036_s12 + $0x28] sm:$0xff] (%p4020_p4) }
  0x16   : > { %235 = vst [vmem:[%s4041_s13 + $0x10] sm:$0xff] (%p4020_p4), %v234_v2  ;;  %v238_v4 = vld [vmem:[%s4036_s12 + $0x40] sm:$0xff] (%p4020_p4)  ;;  %v240_v5 = vld [vmem:[%s4036_s12 + $0x48] sm:$0xff] (%p4020_p4)  ;;  %237 = vst [vmem:[%s4041_s13 + $0x18] sm:$0xff] (%p4020_p4), %v236_v3 }
  0x17   : > { %239 = vst [vmem:[%s4041_s13 + $0x20] sm:$0xff] (%p4020_p4), %v238_v4  ;;  %241 = vst [vmem:[%s4041_s13 + $0x28] sm:$0xff] (%p4020_p4), %v240_v5  ;;  %v242_v6 = vld [vmem:[%s4036_s12 + $0x60] sm:$0xff] (%p4020_p4)  ;;  %v244_v7 = vld [vmem:[%s4036_s12 + $0x68] sm:$0xff] (%p4020_p4) }
  0x18   : > { %v246_v8 = vld [vmem:[%s4036_s12 + $0x80] sm:$0xff]  ;;  %243 = vst [vmem:[%s4041_s13 + $0x30] sm:$0xff] %v242_v6  ;;  %245 = vst [vmem:[%s4041_s13 + $0x38] sm:$0xff] %v244_v7  ;;  %v248_v9 = vld [vmem:[%s4036_s12 + $0x88] sm:$0xff] }
  0x19   : > { %247 = vst [vmem:[%s4041_s13 + $0x40] sm:$0xff] %v246_v8  ;;  %v250_v10 = vld [vmem:[%s4036_s12 + $0xa0] sm:$0xff]  ;;  %v252_v11 = vld [vmem:[%s4036_s12 + $0xa8] sm:$0xff]  ;;  %249 = vst [vmem:[%s4041_s13 + $0x48] sm:$0xff] %v248_v9 }
  0x1a   : > { %251 = vst [vmem:[%s4041_s13 + $0x50] sm:$0xff] %v250_v10  ;;  %253 = vst [vmem:[%s4041_s13 + $0x58] sm:$0xff] %v252_v11  ;;  %v254_v12 = vld [vmem:[%s4036_s12 + $0xc0] sm:$0xff]  ;;  %v256_v13 = vld [vmem:[%s4036_s12 + $0xc8] sm:$0xff] }
  0x1b   : > { %v258_v14 = vld [vmem:[%s4036_s12 + $0xe0] sm:$0xff]  ;;  %255 = vst [vmem:[%s4041_s13 + $0x60] sm:$0xff] %v254_v12  ;;  %257 = vst [vmem:[%s4041_s13 + $0x68] sm:$0xff] %v256_v13  ;;  %v260_v15 = vld [vmem:[%s4036_s12 + $0xe8] sm:$0xff] }
  0x1c   : > { %259 = vst [vmem:[%s4041_s13 + $0x70] sm:$0xff] %v258_v14  ;;  %v262_v16 = vld [vmem:[%s4036_s12 + $0x100] sm:$0xff]  ;;  %v264_v17 = vld [vmem:[%s4036_s12 + $0x108] sm:$0xff]  ;;  %261 = vst [vmem:[%s4041_s13 + $0x78] sm:$0xff] %v260_v15 }
  0x1d   : > { %263 = vst [vmem:[%s4041_s13 + $0x80] sm:$0xff] %v262_v16  ;;  %265 = vst [vmem:[%s4041_s13 + $0x88] sm:$0xff] %v264_v17  ;;  %v266_v18 = vld [vmem:[%s4036_s12 + $0x120] sm:$0xff]  ;;  %v268_v19 = vld [vmem:[%s4036_s12 + $0x128] sm:$0xff] }
  0x1e   : > { %v270_v20 = vld [vmem:[%s4036_s12 + $0x140] sm:$0xff]  ;;  %267 = vst [vmem:[%s4041_s13 + $0x90] sm:$0xff] %v266_v18  ;;  %269 = vst [vmem:[%s4041_s13 + $0x98] sm:$0xff] %v268_v19  ;;  %v272_v21 = vld [vmem:[%s4036_s12 + $0x148] sm:$0xff] }
  0x1f   : > { %271 = vst [vmem:[%s4041_s13 + $0xa0] sm:$0xff] %v270_v20  ;;  %v274_v22 = vld [vmem:[%s4036_s12 + $0x160] sm:$0xff]  ;;  %v276_v23 = vld [vmem:[%s4036_s12 + $0x168] sm:$0xff]  ;;  %273 = vst [vmem:[%s4041_s13 + $0xa8] sm:$0xff] %v272_v21 }
  0x20   : > { %275 = vst [vmem:[%s4041_s13 + $0xb0] sm:$0xff] %v274_v22  ;;  %277 = vst [vmem:[%s4041_s13 + $0xb8] sm:$0xff] %v276_v23  ;;  %v278_v24 = vld [vmem:[%s4036_s12 + $0x180] sm:$0xff]  ;;  %v280_v25 = vld [vmem:[%s4036_s12 + $0x188] sm:$0xff] }
  0x21   : > { %v282_v26 = vld [vmem:[%s4036_s12 + $0x1a0] sm:$0xff]  ;;  %279 = vst [vmem:[%s4041_s13 + $0xc0] sm:$0xff] %v278_v24  ;;  %281 = vst [vmem:[%s4041_s13 + $0xc8] sm:$0xff] %v280_v25  ;;  %v284_v27 = vld [vmem:[%s4036_s12 + $0x1a8] sm:$0xff] }
  0x22   : > { %283 = vst [vmem:[%s4041_s13 + $0xd0] sm:$0xff] %v282_v26  ;;  %v286_v28 = vld [vmem:[%s4036_s12 + $0x1c0] sm:$0xff]  ;;  %v288_v29 = vld [vmem:[%s4036_s12 + $0x1c8] sm:$0xff]  ;;  %285 = vst [vmem:[%s4041_s13 + $0xd8] sm:$0xff] %v284_v27 }
  0x23   : > { %287 = vst [vmem:[%s4041_s13 + $0xe0] sm:$0xff] %v286_v28  ;;  %289 = vst [vmem:[%s4041_s13 + $0xe8] sm:$0xff] %v288_v29  ;;  %v290_v30 = vld [vmem:[%s4036_s12 + $0x1e0] sm:$0xff]  ;;  %v292_v31 = vld [vmem:[%s4036_s12 + $0x1e8] sm:$0xff] }
  0x24   : > { %v294_v32 = vld [vmem:[%s4036_s12 + $0x200] sm:$0xff]  ;;  %291 = vst [vmem:[%s4041_s13 + $0xf0] sm:$0xff] %v290_v30  ;;  %293 = vst [vmem:[%s4041_s13 + $0xf8] sm:$0xff] %v292_v31  ;;  %v296_v33 = vld [vmem:[%s4036_s12 + $0x208] sm:$0xff] }
  0x25   : > { %295 = vst [vmem:[%s4041_s13 + $0x100] sm:$0xff] %v294_v32  ;;  %v298_v34 = vld [vmem:[%s4036_s12 + $0x220] sm:$0xff]  ;;  %v300_v35 = vld [vmem:[%s4036_s12 + $0x228] sm:$0xff]  ;;  %297 = vst [vmem:[%s4041_s13 + $0x108] sm:$0xff] %v296_v33 }
  0x26   : > { %299 = vst [vmem:[%s4041_s13 + $0x110] sm:$0xff] %v298_v34  ;;  %301 = vst [vmem:[%s4041_s13 + $0x118] sm:$0xff] %v300_v35  ;;  %v302_v36 = vld [vmem:[%s4036_s12 + $0x240] sm:$0xff]  ;;  %v304_v37 = vld [vmem:[%s4036_s12 + $0x248] sm:$0xff] }
  0x27   : > { %v306_v38 = vld [vmem:[%s4036_s12 + $0x260] sm:$0xff]  ;;  %303 = vst [vmem:[%s4041_s13 + $0x120] sm:$0xff] %v302_v36  ;;  %305 = vst [vmem:[%s4041_s13 + $0x128] sm:$0xff] %v304_v37  ;;  %v308_v39 = vld [vmem:[%s4036_s12 + $0x268] sm:$0xff] }
  0x28   : > { %307 = vst [vmem:[%s4041_s13 + $0x130] sm:$0xff] %v306_v38  ;;  %v310_v40 = vld [vmem:[%s4036_s12 + $0x280] sm:$0xff]  ;;  %v312_v41 = vld [vmem:[%s4036_s12 + $0x288] sm:$0xff]  ;;  %309 = vst [vmem:[%s4041_s13 + $0x138] sm:$0xff] %v308_v39 }
  0x29   : > { %311 = vst [vmem:[%s4041_s13 + $0x140] sm:$0xff] %v310_v40  ;;  %313 = vst [vmem:[%s4041_s13 + $0x148] sm:$0xff] %v312_v41  ;;  %v314_v42 = vld [vmem:[%s4036_s12 + $0x2a0] sm:$0xff]  ;;  %v316_v43 = vld [vmem:[%s4036_s12 + $0x2a8] sm:$0xff] }
  0x2a   : > { %v318_v44 = vld [vmem:[%s4036_s12 + $0x2c0] sm:$0xff]  ;;  %315 = vst [vmem:[%s4041_s13 + $0x150] sm:$0xff] %v314_v42  ;;  %317 = vst [vmem:[%s4041_s13 + $0x158] sm:$0xff] %v316_v43  ;;  %v320_v45 = vld [vmem:[%s4036_s12 + $0x2c8] sm:$0xff] }
  0x2b   : > { %319 = vst [vmem:[%s4041_s13 + $0x160] sm:$0xff] %v318_v44  ;;  %v322_v46 = vld [vmem:[%s4036_s12 + $0x2e0] sm:$0xff]  ;;  %v324_v47 = vld [vmem:[%s4036_s12 + $0x2e8] sm:$0xff]  ;;  %321 = vst [vmem:[%s4041_s13 + $0x168] sm:$0xff] %v320_v45 }
  0x2c   : > { %323 = vst [vmem:[%s4041_s13 + $0x170] sm:$0xff] %v322_v46  ;;  %325 = vst [vmem:[%s4041_s13 + $0x178] sm:$0xff] %v324_v47  ;;  %v326_v48 = vld [vmem:[%s4036_s12 + $0x300] sm:$0xff]  ;;  %v328_v49 = vld [vmem:[%s4036_s12 + $0x308] sm:$0xff] }
  0x2d   : > { %v330_v50 = vld [vmem:[%s4036_s12 + $0x320] sm:$0xff]  ;;  %327 = vst [vmem:[%s4041_s13 + $0x180] sm:$0xff] %v326_v48  ;;  %329 = vst [vmem:[%s4041_s13 + $0x188] sm:$0xff] %v328_v49  ;;  %v332_v51 = vld [vmem:[%s4036_s12 + $0x328] sm:$0xff] }
  0x2e   : > { %331 = vst [vmem:[%s4041_s13 + $0x190] sm:$0xff] %v330_v50  ;;  %v334_v52 = vld [vmem:[%s4036_s12 + $0x340] sm:$0xff]  ;;  %v336_v53 = vld [vmem:[%s4036_s12 + $0x348] sm:$0xff]  ;;  %333 = vst [vmem:[%s4041_s13 + $0x198] sm:$0xff] %v332_v51 }
  0x2f   : > { %335 = vst [vmem:[%s4041_s13 + $0x1a0] sm:$0xff] %v334_v52  ;;  %337 = vst [vmem:[%s4041_s13 + $0x1a8] sm:$0xff] %v336_v53  ;;  %v338_v54 = vld [vmem:[%s4036_s12 + $0x360] sm:$0xff]  ;;  %v340_v55 = vld [vmem:[%s4036_s12 + $0x368] sm:$0xff] }
  0x30   : > { %v342_v56 = vld [vmem:[%s4036_s12 + $0x380] sm:$0xff]  ;;  %339 = vst [vmem:[%s4041_s13 + $0x1b0] sm:$0xff] %v338_v54  ;;  %341 = vst [vmem:[%s4041_s13 + $0x1b8] sm:$0xff] %v340_v55  ;;  %v344_v57 = vld [vmem:[%s4036_s12 + $0x388] sm:$0xff] }
  0x31   : > { %343 = vst [vmem:[%s4041_s13 + $0x1c0] sm:$0xff] %v342_v56  ;;  %v346_v58 = vld [vmem:[%s4036_s12 + $0x3a0] sm:$0xff]  ;;  %v348_v59 = vld [vmem:[%s4036_s12 + $0x3a8] sm:$0xff]  ;;  %345 = vst [vmem:[%s4041_s13 + $0x1c8] sm:$0xff] %v344_v57 }
  0x32   : > { %347 = vst [vmem:[%s4041_s13 + $0x1d0] sm:$0xff] %v346_v58  ;;  %349 = vst [vmem:[%s4041_s13 + $0x1d8] sm:$0xff] %v348_v59  ;;  %v350_v60 = vld [vmem:[%s4036_s12 + $0x3c0] sm:$0xff]  ;;  %v352_v61 = vld [vmem:[%s4036_s12 + $0x3c8] sm:$0xff] }
  0x33   : > { %v354_v62 = vld [vmem:[%s4036_s12 + $0x3e0] sm:$0xff]  ;;  %351 = vst [vmem:[%s4041_s13 + $0x1e0] sm:$0xff] %v350_v60  ;;  %353 = vst [vmem:[%s4041_s13 + $0x1e8] sm:$0xff] %v352_v61  ;;  %v356_v63 = vld [vmem:[%s4036_s12 + $0x3e8] sm:$0xff] }
  0x34   : > { %355 = vst [vmem:[%s4041_s13 + $0x1f0] sm:$0xff] %v354_v62  ;;  %v358_v0 = vld [vmem:[%s4036_s12 + $0x400] sm:$0xff]  ;;  %v360_v1 = vld [vmem:[%s4036_s12 + $0x408] sm:$0xff]  ;;  %357 = vst [vmem:[%s4041_s13 + $0x1f8] sm:$0xff] %v356_v63 }
  0x35   : > { %359 = vst [vmem:[%s4041_s13 + $0x200] sm:$0xff] %v358_v0  ;;  %361 = vst [vmem:[%s4041_s13 + $0x208] sm:$0xff] %v360_v1  ;;  %v362_v2 = vld [vmem:[%s4036_s12 + $0x420] sm:$0xff]  ;;  %v364_v3 = vld [vmem:[%s4036_s12 + $0x428] sm:$0xff] }
  0x36   : > { %v366_v4 = vld [vmem:[%s4036_s12 + $0x440] sm:$0xff]  ;;  %363 = vst [vmem:[%s4041_s13 + $0x210] sm:$0xff] %v362_v2  ;;  %365 = vst [vmem:[%s4041_s13 + $0x218] sm:$0xff] %v364_v3  ;;  %v368_v5 = vld [vmem:[%s4036_s12 + $0x448] sm:$0xff] }
  0x37   : > { %367 = vst [vmem:[%s4041_s13 + $0x220] sm:$0xff] %v366_v4  ;;  %v370_v6 = vld [vmem:[%s4036_s12 + $0x460] sm:$0xff]  ;;  %v372_v7 = vld [vmem:[%s4036_s12 + $0x468] sm:$0xff]  ;;  %369 = vst [vmem:[%s4041_s13 + $0x228] sm:$0xff] %v368_v5 }
  0x38   : > { %371 = vst [vmem:[%s4041_s13 + $0x230] sm:$0xff] %v370_v6  ;;  %373 = vst [vmem:[%s4041_s13 + $0x238] sm:$0xff] %v372_v7  ;;  %v374_v8 = vld [vmem:[%s4036_s12 + $0x480] sm:$0xff]  ;;  %v376_v9 = vld [vmem:[%s4036_s12 + $0x488] sm:$0xff] }
  0x39   : > { %v378_v10 = vld [vmem:[%s4036_s12 + $0x4a0] sm:$0xff]  ;;  %375 = vst [vmem:[%s4041_s13 + $0x240] sm:$0xff] %v374_v8  ;;  %377 = vst [vmem:[%s4041_s13 + $0x248] sm:$0xff] %v376_v9  ;;  %v380_v11 = vld [vmem:[%s4036_s12 + $0x4a8] sm:$0xff] }
  0x3a   : > { %379 = vst [vmem:[%s4041_s13 + $0x250] sm:$0xff] %v378_v10  ;;  %v382_v12 = vld [vmem:[%s4036_s12 + $0x4c0] sm:$0xff]  ;;  %v384_v13 = vld [vmem:[%s4036_s12 + $0x4c8] sm:$0xff]  ;;  %381 = vst [vmem:[%s4041_s13 + $0x258] sm:$0xff] %v380_v11 }
  0x3b   : > { %383 = vst [vmem:[%s4041_s13 + $0x260] sm:$0xff] %v382_v12  ;;  %385 = vst [vmem:[%s4041_s13 + $0x268] sm:$0xff] %v384_v13  ;;  %v386_v14 = vld [vmem:[%s4036_s12 + $0x4e0] sm:$0xff]  ;;  %v388_v15 = vld [vmem:[%s4036_s12 + $0x4e8] sm:$0xff] }
  0x3c   : > { %v390_v16 = vld [vmem:[%s4036_s12 + $0x500] sm:$0xff]  ;;  %387 = vst [vmem:[%s4041_s13 + $0x270] sm:$0xff] %v386_v14  ;;  %389 = vst [vmem:[%s4041_s13 + $0x278] sm:$0xff] %v388_v15  ;;  %v392_v17 = vld [vmem:[%s4036_s12 + $0x508] sm:$0xff] }
  0x3d   : > { %391 = vst [vmem:[%s4041_s13 + $0x280] sm:$0xff] %v390_v16  ;;  %v394_v18 = vld [vmem:[%s4036_s12 + $0x520] sm:$0xff]  ;;  %v396_v19 = vld [vmem:[%s4036_s12 + $0x528] sm:$0xff]  ;;  %393 = vst [vmem:[%s4041_s13 + $0x288] sm:$0xff] %v392_v17 }
  0x3e   : > { %395 = vst [vmem:[%s4041_s13 + $0x290] sm:$0xff] %v394_v18  ;;  %397 = vst [vmem:[%s4041_s13 + $0x298] sm:$0xff] %v396_v19  ;;  %v398_v20 = vld [vmem:[%s4036_s12 + $0x540] sm:$0xff]  ;;  %v400_v21 = vld [vmem:[%s4036_s12 + $0x548] sm:$0xff] }
  0x3f   : > { %v402_v22 = vld [vmem:[%s4036_s12 + $0x560] sm:$0xff]  ;;  %399 = vst [vmem:[%s4041_s13 + $0x2a0] sm:$0xff] %v398_v20  ;;  %401 = vst [vmem:[%s4041_s13 + $0x2a8] sm:$0xff] %v400_v21  ;;  %v404_v23 = vld [vmem:[%s4036_s12 + $0x568] sm:$0xff] }
  0x40   : > { %403 = vst [vmem:[%s4041_s13 + $0x2b0] sm:$0xff] %v402_v22  ;;  %v406_v24 = vld [vmem:[%s4036_s12 + $0x580] sm:$0xff]  ;;  %v408_v25 = vld [vmem:[%s4036_s12 + $0x588] sm:$0xff]  ;;  %405 = vst [vmem:[%s4041_s13 + $0x2b8] sm:$0xff] %v404_v23 }
  0x41   : > { %407 = vst [vmem:[%s4041_s13 + $0x2c0] sm:$0xff] %v406_v24  ;;  %409 = vst [vmem:[%s4041_s13 + $0x2c8] sm:$0xff] %v408_v25  ;;  %v410_v26 = vld [vmem:[%s4036_s12 + $0x5a0] sm:$0xff]  ;;  %v412_v27 = vld [vmem:[%s4036_s12 + $0x5a8] sm:$0xff] }
  0x42   : > { %v414_v28 = vld [vmem:[%s4036_s12 + $0x5c0] sm:$0xff]  ;;  %411 = vst [vmem:[%s4041_s13 + $0x2d0] sm:$0xff] %v410_v26  ;;  %413 = vst [vmem:[%s4041_s13 + $0x2d8] sm:$0xff] %v412_v27  ;;  %v416_v29 = vld [vmem:[%s4036_s12 + $0x5c8] sm:$0xff] }
  0x43   : > { %415 = vst [vmem:[%s4041_s13 + $0x2e0] sm:$0xff] %v414_v28  ;;  %v418_v30 = vld [vmem:[%s4036_s12 + $0x5e0] sm:$0xff]  ;;  %v420_v31 = vld [vmem:[%s4036_s12 + $0x5e8] sm:$0xff]  ;;  %417 = vst [vmem:[%s4041_s13 + $0x2e8] sm:$0xff] %v416_v29 }
  0x44   : > { %419 = vst [vmem:[%s4041_s13 + $0x2f0] sm:$0xff] %v418_v30  ;;  %421 = vst [vmem:[%s4041_s13 + $0x2f8] sm:$0xff] %v420_v31  ;;  %v422_v32 = vld [vmem:[%s4036_s12 + $0x600] sm:$0xff]  ;;  %v424_v33 = vld [vmem:[%s4036_s12 + $0x608] sm:$0xff] }
  0x45   : > { %v426_v34 = vld [vmem:[%s4036_s12 + $0x620] sm:$0xff]  ;;  %423 = vst [vmem:[%s4041_s13 + $0x300] sm:$0xff] %v422_v32  ;;  %425 = vst [vmem:[%s4041_s13 + $0x308] sm:$0xff] %v424_v33  ;;  %v428_v35 = vld [vmem:[%s4036_s12 + $0x628] sm:$0xff] }
  0x46   : > { %427 = vst [vmem:[%s4041_s13 + $0x310] sm:$0xff] %v426_v34  ;;  %v430_v36 = vld [vmem:[%s4036_s12 + $0x640] sm:$0xff]  ;;  %v432_v37 = vld [vmem:[%s4036_s12 + $0x648] sm:$0xff]  ;;  %429 = vst [vmem:[%s4041_s13 + $0x318] sm:$0xff] %v428_v35 }
  0x47   : > { %431 = vst [vmem:[%s4041_s13 + $0x320] sm:$0xff] %v430_v36  ;;  %433 = vst [vmem:[%s4041_s13 + $0x328] sm:$0xff] %v432_v37  ;;  %v434_v38 = vld [vmem:[%s4036_s12 + $0x660] sm:$0xff]  ;;  %v436_v39 = vld [vmem:[%s4036_s12 + $0x668] sm:$0xff] }
  0x48   : > { %v438_v40 = vld [vmem:[%s4036_s12 + $0x680] sm:$0xff]  ;;  %435 = vst [vmem:[%s4041_s13 + $0x330] sm:$0xff] %v434_v38  ;;  %437 = vst [vmem:[%s4041_s13 + $0x338] sm:$0xff] %v436_v39  ;;  %v440_v41 = vld [vmem:[%s4036_s12 + $0x688] sm:$0xff] }
  0x49   : > { %439 = vst [vmem:[%s4041_s13 + $0x340] sm:$0xff] %v438_v40  ;;  %v442_v42 = vld [vmem:[%s4036_s12 + $0x6a0] sm:$0xff]  ;;  %v444_v43 = vld [vmem:[%s4036_s12 + $0x6a8] sm:$0xff]  ;;  %441 = vst [vmem:[%s4041_s13 + $0x348] sm:$0xff] %v440_v41 }
  0x4a   : > { %443 = vst [vmem:[%s4041_s13 + $0x350] sm:$0xff] %v442_v42  ;;  %445 = vst [vmem:[%s4041_s13 + $0x358] sm:$0xff] %v444_v43  ;;  %v446_v44 = vld [vmem:[%s4036_s12 + $0x6c0] sm:$0xff]  ;;  %v448_v45 = vld [vmem:[%s4036_s12 + $0x6c8] sm:$0xff] }
  0x4b   : > { %v450_v46 = vld [vmem:[%s4036_s12 + $0x6e0] sm:$0xff]  ;;  %447 = vst [vmem:[%s4041_s13 + $0x360] sm:$0xff] %v446_v44  ;;  %449 = vst [vmem:[%s4041_s13 + $0x368] sm:$0xff] %v448_v45  ;;  %v452_v47 = vld [vmem:[%s4036_s12 + $0x6e8] sm:$0xff] }
  0x4c   : > { %451 = vst [vmem:[%s4041_s13 + $0x370] sm:$0xff] %v450_v46  ;;  %v454_v48 = vld [vmem:[%s4036_s12 + $0x700] sm:$0xff]  ;;  %v456_v49 = vld [vmem:[%s4036_s12 + $0x708] sm:$0xff]  ;;  %453 = vst [vmem:[%s4041_s13 + $0x378] sm:$0xff] %v452_v47 }
  0x4d   : > { %455 = vst [vmem:[%s4041_s13 + $0x380] sm:$0xff] %v454_v48  ;;  %457 = vst [vmem:[%s4041_s13 + $0x388] sm:$0xff] %v456_v49  ;;  %v458_v50 = vld [vmem:[%s4036_s12 + $0x720] sm:$0xff]  ;;  %v460_v51 = vld [vmem:[%s4036_s12 + $0x728] sm:$0xff] }
  0x4e   : > { %v462_v52 = vld [vmem:[%s4036_s12 + $0x740] sm:$0xff]  ;;  %459 = vst [vmem:[%s4041_s13 + $0x390] sm:$0xff] %v458_v50  ;;  %461 = vst [vmem:[%s4041_s13 + $0x398] sm:$0xff] %v460_v51  ;;  %v464_v53 = vld [vmem:[%s4036_s12 + $0x748] sm:$0xff] }
  0x4f   : > { %463 = vst [vmem:[%s4041_s13 + $0x3a0] sm:$0xff] %v462_v52  ;;  %v466_v54 = vld [vmem:[%s4036_s12 + $0x760] sm:$0xff]  ;;  %v468_v55 = vld [vmem:[%s4036_s12 + $0x768] sm:$0xff]  ;;  %465 = vst [vmem:[%s4041_s13 + $0x3a8] sm:$0xff] %v464_v53 }
  0x50   : > { %467 = vst [vmem:[%s4041_s13 + $0x3b0] sm:$0xff] %v466_v54  ;;  %469 = vst [vmem:[%s4041_s13 + $0x3b8] sm:$0xff] %v468_v55  ;;  %v470_v56 = vld [vmem:[%s4036_s12 + $0x780] sm:$0xff]  ;;  %v472_v57 = vld [vmem:[%s4036_s12 + $0x788] sm:$0xff] }
  0x51   : > { %v474_v58 = vld [vmem:[%s4036_s12 + $0x7a0] sm:$0xff]  ;;  %471 = vst [vmem:[%s4041_s13 + $0x3c0] sm:$0xff] %v470_v56  ;;  %473 = vst [vmem:[%s4041_s13 + $0x3c8] sm:$0xff] %v472_v57  ;;  %v476_v59 = vld [vmem:[%s4036_s12 + $0x7a8] sm:$0xff] }
  0x52   : > { %475 = vst [vmem:[%s4041_s13 + $0x3d0] sm:$0xff] %v474_v58  ;;  %v478_v60 = vld [vmem:[%s4036_s12 + $0x7c0] sm:$0xff]  ;;  %v480_v61 = vld [vmem:[%s4036_s12 + $0x7c8] sm:$0xff]  ;;  %477 = vst [vmem:[%s4041_s13 + $0x3d8] sm:$0xff] %v476_v59 }
  0x53   : > { %479 = vst [vmem:[%s4041_s13 + $0x3e0] sm:$0xff] %v478_v60  ;;  %481 = vst [vmem:[%s4041_s13 + $0x3e8] sm:$0xff] %v480_v61  ;;  %v482_v62 = vld [vmem:[%s4036_s12 + $0x7e0] sm:$0xff]  ;;  %v484_v63 = vld [vmem:[%s4036_s12 + $0x7e8] sm:$0xff] }
  0x54   : > { %v486_v0 = vld [vmem:[%s4036_s12 + $0x800] sm:$0xff]  ;;  %483 = vst [vmem:[%s4041_s13 + $0x3f0] sm:$0xff] %v482_v62  ;;  %485 = vst [vmem:[%s4041_s13 + $0x3f8] sm:$0xff] %v484_v63  ;;  %v488_v1 = vld [vmem:[%s4036_s12 + $0x808] sm:$0xff] }
  0x55   : > { %487 = vst [vmem:[%s4041_s13 + $0x400] sm:$0xff] %v486_v0  ;;  %v490_v2 = vld [vmem:[%s4036_s12 + $0x820] sm:$0xff]  ;;  %v492_v3 = vld [vmem:[%s4036_s12 + $0x828] sm:$0xff]  ;;  %489 = vst [vmem:[%s4041_s13 + $0x408] sm:$0xff] %v488_v1 }
  0x56   : > { %491 = vst [vmem:[%s4041_s13 + $0x410] sm:$0xff] %v490_v2  ;;  %493 = vst [vmem:[%s4041_s13 + $0x418] sm:$0xff] %v492_v3  ;;  %v494_v4 = vld [vmem:[%s4036_s12 + $0x840] sm:$0xff]  ;;  %v496_v5 = vld [vmem:[%s4036_s12 + $0x848] sm:$0xff] }
  0x57   : > { %v498_v6 = vld [vmem:[%s4036_s12 + $0x860] sm:$0xff]  ;;  %495 = vst [vmem:[%s4041_s13 + $0x420] sm:$0xff] %v494_v4  ;;  %497 = vst [vmem:[%s4041_s13 + $0x428] sm:$0xff] %v496_v5  ;;  %v500_v7 = vld [vmem:[%s4036_s12 + $0x868] sm:$0xff] }
  0x58   : > { %499 = vst [vmem:[%s4041_s13 + $0x430] sm:$0xff] %v498_v6  ;;  %v502_v8 = vld [vmem:[%s4036_s12 + $0x880] sm:$0xff]  ;;  %v504_v9 = vld [vmem:[%s4036_s12 + $0x888] sm:$0xff]  ;;  %501 = vst [vmem:[%s4041_s13 + $0x438] sm:$0xff] %v500_v7 }
  0x59   : > { %503 = vst [vmem:[%s4041_s13 + $0x440] sm:$0xff] %v502_v8  ;;  %505 = vst [vmem:[%s4041_s13 + $0x448] sm:$0xff] %v504_v9  ;;  %v506_v10 = vld [vmem:[%s4036_s12 + $0x8a0] sm:$0xff]  ;;  %v508_v11 = vld [vmem:[%s4036_s12 + $0x8a8] sm:$0xff] }
  0x5a   : > { %v510_v12 = vld [vmem:[%s4036_s12 + $0x8c0] sm:$0xff]  ;;  %507 = vst [vmem:[%s4041_s13 + $0x450] sm:$0xff] %v506_v10  ;;  %509 = vst [vmem:[%s4041_s13 + $0x458] sm:$0xff] %v508_v11  ;;  %v512_v13 = vld [vmem:[%s4036_s12 + $0x8c8] sm:$0xff] }
  0x5b   : > { %511 = vst [vmem:[%s4041_s13 + $0x460] sm:$0xff] %v510_v12  ;;  %v514_v14 = vld [vmem:[%s4036_s12 + $0x8e0] sm:$0xff]  ;;  %v516_v15 = vld [vmem:[%s4036_s12 + $0x8e8] sm:$0xff]  ;;  %513 = vst [vmem:[%s4041_s13 + $0x468] sm:$0xff] %v512_v13 }
  0x5c   : > { %515 = vst [vmem:[%s4041_s13 + $0x470] sm:$0xff] %v514_v14  ;;  %517 = vst [vmem:[%s4041_s13 + $0x478] sm:$0xff] %v516_v15  ;;  %v518_v16 = vld [vmem:[%s4036_s12 + $0x900] sm:$0xff]  ;;  %v520_v17 = vld [vmem:[%s4036_s12 + $0x908] sm:$0xff] }
  0x5d   : > { %v522_v18 = vld [vmem:[%s4036_s12 + $0x920] sm:$0xff]  ;;  %519 = vst [vmem:[%s4041_s13 + $0x480] sm:$0xff] %v518_v16  ;;  %521 = vst [vmem:[%s4041_s13 + $0x488] sm:$0xff] %v520_v17  ;;  %v524_v19 = vld [vmem:[%s4036_s12 + $0x928] sm:$0xff] }
  0x5e   : > { %523 = vst [vmem:[%s4041_s13 + $0x490] sm:$0xff] %v522_v18  ;;  %v526_v20 = vld [vmem:[%s4036_s12 + $0x940] sm:$0xff]  ;;  %v528_v21 = vld [vmem:[%s4036_s12 + $0x948] sm:$0xff]  ;;  %525 = vst [vmem:[%s4041_s13 + $0x498] sm:$0xff] %v524_v19 }
  0x5f   : > { %527 = vst [vmem:[%s4041_s13 + $0x4a0] sm:$0xff] %v526_v20  ;;  %529 = vst [vmem:[%s4041_s13 + $0x4a8] sm:$0xff] %v528_v21  ;;  %v530_v22 = vld [vmem:[%s4036_s12 + $0x960] sm:$0xff]  ;;  %v532_v23 = vld [vmem:[%s4036_s12 + $0x968] sm:$0xff] }
  0x60   : > { %v534_v24 = vld [vmem:[%s4036_s12 + $0x980] sm:$0xff]  ;;  %531 = vst [vmem:[%s4041_s13 + $0x4b0] sm:$0xff] %v530_v22  ;;  %533 = vst [vmem:[%s4041_s13 + $0x4b8] sm:$0xff] %v532_v23  ;;  %v536_v25 = vld [vmem:[%s4036_s12 + $0x988] sm:$0xff] }
  0x61   : > { %535 = vst [vmem:[%s4041_s13 + $0x4c0] sm:$0xff] %v534_v24  ;;  %v538_v26 = vld [vmem:[%s4036_s12 + $0x9a0] sm:$0xff]  ;;  %v540_v27 = vld [vmem:[%s4036_s12 + $0x9a8] sm:$0xff]  ;;  %537 = vst [vmem:[%s4041_s13 + $0x4c8] sm:$0xff] %v536_v25 }
  0x62   : > { %539 = vst [vmem:[%s4041_s13 + $0x4d0] sm:$0xff] %v538_v26  ;;  %541 = vst [vmem:[%s4041_s13 + $0x4d8] sm:$0xff] %v540_v27  ;;  %v542_v28 = vld [vmem:[%s4036_s12 + $0x9c0] sm:$0xff]  ;;  %v544_v29 = vld [vmem:[%s4036_s12 + $0x9c8] sm:$0xff] }
  0x63   : > { %v546_v30 = vld [vmem:[%s4036_s12 + $0x9e0] sm:$0xff]  ;;  %543 = vst [vmem:[%s4041_s13 + $0x4e0] sm:$0xff] %v542_v28  ;;  %545 = vst [vmem:[%s4041_s13 + $0x4e8] sm:$0xff] %v544_v29  ;;  %v548_v31 = vld [vmem:[%s4036_s12 + $0x9e8] sm:$0xff] }
  0x64   : > { %547 = vst [vmem:[%s4041_s13 + $0x4f0] sm:$0xff] %v546_v30  ;;  %v550_v32 = vld [vmem:[%s4036_s12 + $0xa00] sm:$0xff]  ;;  %v552_v33 = vld [vmem:[%s4036_s12 + $0xa08] sm:$0xff]  ;;  %549 = vst [vmem:[%s4041_s13 + $0x4f8] sm:$0xff] %v548_v31 }
  0x65   : > { %551 = vst [vmem:[%s4041_s13 + $0x500] sm:$0xff] %v550_v32  ;;  %553 = vst [vmem:[%s4041_s13 + $0x508] sm:$0xff] %v552_v33  ;;  %v554_v34 = vld [vmem:[%s4036_s12 + $0xa20] sm:$0xff]  ;;  %v556_v35 = vld [vmem:[%s4036_s12 + $0xa28] sm:$0xff] }
  0x66   : > { %v558_v36 = vld [vmem:[%s4036_s12 + $0xa40] sm:$0xff]  ;;  %555 = vst [vmem:[%s4041_s13 + $0x510] sm:$0xff] %v554_v34  ;;  %557 = vst [vmem:[%s4041_s13 + $0x518] sm:$0xff] %v556_v35  ;;  %v560_v37 = vld [vmem:[%s4036_s12 + $0xa48] sm:$0xff] }
  0x67   : > { %559 = vst [vmem:[%s4041_s13 + $0x520] sm:$0xff] %v558_v36  ;;  %v562_v38 = vld [vmem:[%s4036_s12 + $0xa60] sm:$0xff]  ;;  %v564_v39 = vld [vmem:[%s4036_s12 + $0xa68] sm:$0xff]  ;;  %561 = vst [vmem:[%s4041_s13 + $0x528] sm:$0xff] %v560_v37 }
  0x68   : > { %563 = vst [vmem:[%s4041_s13 + $0x530] sm:$0xff] %v562_v38  ;;  %565 = vst [vmem:[%s4041_s13 + $0x538] sm:$0xff] %v564_v39  ;;  %v566_v40 = vld [vmem:[%s4036_s12 + $0xa80] sm:$0xff]  ;;  %v568_v41 = vld [vmem:[%s4036_s12 + $0xa88] sm:$0xff] }
  0x69   : > { %v570_v42 = vld [vmem:[%s4036_s12 + $0xaa0] sm:$0xff]  ;;  %567 = vst [vmem:[%s4041_s13 + $0x540] sm:$0xff] %v566_v40  ;;  %569 = vst [vmem:[%s4041_s13 + $0x548] sm:$0xff] %v568_v41  ;;  %v572_v43 = vld [vmem:[%s4036_s12 + $0xaa8] sm:$0xff] }
  0x6a   : > { %571 = vst [vmem:[%s4041_s13 + $0x550] sm:$0xff] %v570_v42  ;;  %v574_v44 = vld [vmem:[%s4036_s12 + $0xac0] sm:$0xff]  ;;  %v576_v45 = vld [vmem:[%s4036_s12 + $0xac8] sm:$0xff]  ;;  %573 = vst [vmem:[%s4041_s13 + $0x558] sm:$0xff] %v572_v43 }
  0x6b   : > { %575 = vst [vmem:[%s4041_s13 + $0x560] sm:$0xff] %v574_v44  ;;  %577 = vst [vmem:[%s4041_s13 + $0x568] sm:$0xff] %v576_v45  ;;  %v578_v46 = vld [vmem:[%s4036_s12 + $0xae0] sm:$0xff]  ;;  %v580_v47 = vld [vmem:[%s4036_s12 + $0xae8] sm:$0xff] }
  0x6c   : > { %v582_v48 = vld [vmem:[%s4036_s12 + $0xb00] sm:$0xff]  ;;  %579 = vst [vmem:[%s4041_s13 + $0x570] sm:$0xff] %v578_v46  ;;  %581 = vst [vmem:[%s4041_s13 + $0x578] sm:$0xff] %v580_v47  ;;  %v584_v49 = vld [vmem:[%s4036_s12 + $0xb08] sm:$0xff] }
  0x6d   : > { %583 = vst [vmem:[%s4041_s13 + $0x580] sm:$0xff] %v582_v48  ;;  %v586_v50 = vld [vmem:[%s4036_s12 + $0xb20] sm:$0xff]  ;;  %v588_v51 = vld [vmem:[%s4036_s12 + $0xb28] sm:$0xff]  ;;  %585 = vst [vmem:[%s4041_s13 + $0x588] sm:$0xff] %v584_v49 }
  0x6e   : > { %587 = vst [vmem:[%s4041_s13 + $0x590] sm:$0xff] %v586_v50  ;;  %589 = vst [vmem:[%s4041_s13 + $0x598] sm:$0xff] %v588_v51  ;;  %v590_v52 = vld [vmem:[%s4036_s12 + $0xb40] sm:$0xff]  ;;  %v592_v53 = vld [vmem:[%s4036_s12 + $0xb48] sm:$0xff] }
  0x6f   : > { %v594_v54 = vld [vmem:[%s4036_s12 + $0xb60] sm:$0xff]  ;;  %591 = vst [vmem:[%s4041_s13 + $0x5a0] sm:$0xff] %v590_v52  ;;  %593 = vst [vmem:[%s4041_s13 + $0x5a8] sm:$0xff] %v592_v53  ;;  %v596_v55 = vld [vmem:[%s4036_s12 + $0xb68] sm:$0xff] }
  0x70   : > { %595 = vst [vmem:[%s4041_s13 + $0x5b0] sm:$0xff] %v594_v54  ;;  %v598_v56 = vld [vmem:[%s4036_s12 + $0xb80] sm:$0xff]  ;;  %v600_v57 = vld [vmem:[%s4036_s12 + $0xb88] sm:$0xff]  ;;  %597 = vst [vmem:[%s4041_s13 + $0x5b8] sm:$0xff] %v596_v55 }
  0x71   : > { %599 = vst [vmem:[%s4041_s13 + $0x5c0] sm:$0xff] %v598_v56  ;;  %601 = vst [vmem:[%s4041_s13 + $0x5c8] sm:$0xff] %v600_v57  ;;  %v602_v58 = vld [vmem:[%s4036_s12 + $0xba0] sm:$0xff]  ;;  %v604_v59 = vld [vmem:[%s4036_s12 + $0xba8] sm:$0xff] }
  0x72   : > { %v606_v60 = vld [vmem:[%s4036_s12 + $0xbc0] sm:$0xff]  ;;  %603 = vst [vmem:[%s4041_s13 + $0x5d0] sm:$0xff] %v602_v58  ;;  %605 = vst [vmem:[%s4041_s13 + $0x5d8] sm:$0xff] %v604_v59  ;;  %v608_v61 = vld [vmem:[%s4036_s12 + $0xbc8] sm:$0xff] }
  0x73   : > { %607 = vst [vmem:[%s4041_s13 + $0x5e0] sm:$0xff] %v606_v60  ;;  %v610_v62 = vld [vmem:[%s4036_s12 + $0xbe0] sm:$0xff]  ;;  %v612_v63 = vld [vmem:[%s4036_s12 + $0xbe8] sm:$0xff]  ;;  %609 = vst [vmem:[%s4041_s13 + $0x5e8] sm:$0xff] %v608_v61 }
  0x74   : > { %611 = vst [vmem:[%s4041_s13 + $0x5f0] sm:$0xff] %v610_v62  ;;  %613 = vst [vmem:[%s4041_s13 + $0x5f8] sm:$0xff] %v612_v63  ;;  %v614_v0 = vld [vmem:[%s4036_s12 + $0xc00] sm:$0xff]  ;;  %v616_v1 = vld [vmem:[%s4036_s12 + $0xc08] sm:$0xff] }
  0x75   : > { %v618_v2 = vld [vmem:[%s4036_s12 + $0xc20] sm:$0xff]  ;;  %615 = vst [vmem:[%s4041_s13 + $0x600] sm:$0xff] %v614_v0  ;;  %617 = vst [vmem:[%s4041_s13 + $0x608] sm:$0xff] %v616_v1  ;;  %v620_v3 = vld [vmem:[%s4036_s12 + $0xc28] sm:$0xff] }
  0x76   : > { %619 = vst [vmem:[%s4041_s13 + $0x610] sm:$0xff] %v618_v2  ;;  %v622_v4 = vld [vmem:[%s4036_s12 + $0xc40] sm:$0xff]  ;;  %v624_v5 = vld [vmem:[%s4036_s12 + $0xc48] sm:$0xff]  ;;  %621 = vst [vmem:[%s4041_s13 + $0x618] sm:$0xff] %v620_v3 }
  0x77   : > { %623 = vst [vmem:[%s4041_s13 + $0x620] sm:$0xff] %v622_v4  ;;  %625 = vst [vmem:[%s4041_s13 + $0x628] sm:$0xff] %v624_v5  ;;  %v626_v6 = vld [vmem:[%s4036_s12 + $0xc60] sm:$0xff]  ;;  %v628_v7 = vld [vmem:[%s4036_s12 + $0xc68] sm:$0xff] }
  0x78   : > { %v630_v8 = vld [vmem:[%s4036_s12 + $0xc80] sm:$0xff]  ;;  %627 = vst [vmem:[%s4041_s13 + $0x630] sm:$0xff] %v626_v6  ;;  %629 = vst [vmem:[%s4041_s13 + $0x638] sm:$0xff] %v628_v7  ;;  %v632_v9 = vld [vmem:[%s4036_s12 + $0xc88] sm:$0xff] }
  0x79   : > { %631 = vst [vmem:[%s4041_s13 + $0x640] sm:$0xff] %v630_v8  ;;  %v634_v10 = vld [vmem:[%s4036_s12 + $0xca0] sm:$0xff]  ;;  %v636_v11 = vld [vmem:[%s4036_s12 + $0xca8] sm:$0xff]  ;;  %633 = vst [vmem:[%s4041_s13 + $0x648] sm:$0xff] %v632_v9 }
  0x7a   : > { %635 = vst [vmem:[%s4041_s13 + $0x650] sm:$0xff] %v634_v10  ;;  %637 = vst [vmem:[%s4041_s13 + $0x658] sm:$0xff] %v636_v11  ;;  %v638_v12 = vld [vmem:[%s4036_s12 + $0xcc0] sm:$0xff]  ;;  %v640_v13 = vld [vmem:[%s4036_s12 + $0xcc8] sm:$0xff] }
  0x7b   : > { %v642_v14 = vld [vmem:[%s4036_s12 + $0xce0] sm:$0xff]  ;;  %639 = vst [vmem:[%s4041_s13 + $0x660] sm:$0xff] %v638_v12  ;;  %641 = vst [vmem:[%s4041_s13 + $0x668] sm:$0xff] %v640_v13  ;;  %v644_v15 = vld [vmem:[%s4036_s12 + $0xce8] sm:$0xff] }
  0x7c   : > { %643 = vst [vmem:[%s4041_s13 + $0x670] sm:$0xff] %v642_v14  ;;  %v646_v16 = vld [vmem:[%s4036_s12 + $0xd00] sm:$0xff]  ;;  %v648_v17 = vld [vmem:[%s4036_s12 + $0xd08] sm:$0xff]  ;;  %645 = vst [vmem:[%s4041_s13 + $0x678] sm:$0xff] %v644_v15 }
  0x7d   : > { %647 = vst [vmem:[%s4041_s13 + $0x680] sm:$0xff] %v646_v16  ;;  %649 = vst [vmem:[%s4041_s13 + $0x688] sm:$0xff] %v648_v17  ;;  %v650_v18 = vld [vmem:[%s4036_s12 + $0xd20] sm:$0xff]  ;;  %v652_v19 = vld [vmem:[%s4036_s12 + $0xd28] sm:$0xff] }
  0x7e   : > { %v654_v20 = vld [vmem:[%s4036_s12 + $0xd40] sm:$0xff]  ;;  %651 = vst [vmem:[%s4041_s13 + $0x690] sm:$0xff] %v650_v18  ;;  %653 = vst [vmem:[%s4041_s13 + $0x698] sm:$0xff] %v652_v19  ;;  %v656_v21 = vld [vmem:[%s4036_s12 + $0xd48] sm:$0xff] }
  0x7f   : > { %655 = vst [vmem:[%s4041_s13 + $0x6a0] sm:$0xff] %v654_v20  ;;  %v658_v22 = vld [vmem:[%s4036_s12 + $0xd60] sm:$0xff]  ;;  %v660_v23 = vld [vmem:[%s4036_s12 + $0xd68] sm:$0xff]  ;;  %657 = vst [vmem:[%s4041_s13 + $0x6a8] sm:$0xff] %v656_v21 }
  0x80   : > { %659 = vst [vmem:[%s4041_s13 + $0x6b0] sm:$0xff] %v658_v22  ;;  %661 = vst [vmem:[%s4041_s13 + $0x6b8] sm:$0xff] %v660_v23  ;;  %v662_v24 = vld [vmem:[%s4036_s12 + $0xd80] sm:$0xff]  ;;  %v664_v25 = vld [vmem:[%s4036_s12 + $0xd88] sm:$0xff] }
  0x81   : > { %v666_v26 = vld [vmem:[%s4036_s12 + $0xda0] sm:$0xff]  ;;  %663 = vst [vmem:[%s4041_s13 + $0x6c0] sm:$0xff] %v662_v24  ;;  %665 = vst [vmem:[%s4041_s13 + $0x6c8] sm:$0xff] %v664_v25  ;;  %v668_v27 = vld [vmem:[%s4036_s12 + $0xda8] sm:$0xff] }
  0x82   : > { %667 = vst [vmem:[%s4041_s13 + $0x6d0] sm:$0xff] %v666_v26  ;;  %v670_v28 = vld [vmem:[%s4036_s12 + $0xdc0] sm:$0xff]  ;;  %v672_v29 = vld [vmem:[%s4036_s12 + $0xdc8] sm:$0xff]  ;;  %669 = vst [vmem:[%s4041_s13 + $0x6d8] sm:$0xff] %v668_v27 }
  0x83   : > { %671 = vst [vmem:[%s4041_s13 + $0x6e0] sm:$0xff] %v670_v28  ;;  %673 = vst [vmem:[%s4041_s13 + $0x6e8] sm:$0xff] %v672_v29  ;;  %v674_v30 = vld [vmem:[%s4036_s12 + $0xde0] sm:$0xff]  ;;  %v676_v31 = vld [vmem:[%s4036_s12 + $0xde8] sm:$0xff] }
  0x84   : > { %v678_v32 = vld [vmem:[%s4036_s12 + $0xe00] sm:$0xff]  ;;  %675 = vst [vmem:[%s4041_s13 + $0x6f0] sm:$0xff] %v674_v30  ;;  %677 = vst [vmem:[%s4041_s13 + $0x6f8] sm:$0xff] %v676_v31  ;;  %v680_v33 = vld [vmem:[%s4036_s12 + $0xe08] sm:$0xff] }
  0x85   : > { %679 = vst [vmem:[%s4041_s13 + $0x700] sm:$0xff] %v678_v32  ;;  %v682_v34 = vld [vmem:[%s4036_s12 + $0xe20] sm:$0xff]  ;;  %v684_v35 = vld [vmem:[%s4036_s12 + $0xe28] sm:$0xff]  ;;  %681 = vst [vmem:[%s4041_s13 + $0x708] sm:$0xff] %v680_v33 }
  0x86   : > { %683 = vst [vmem:[%s4041_s13 + $0x710] sm:$0xff] %v682_v34  ;;  %685 = vst [vmem:[%s4041_s13 + $0x718] sm:$0xff] %v684_v35  ;;  %v686_v36 = vld [vmem:[%s4036_s12 + $0xe40] sm:$0xff]  ;;  %v688_v37 = vld [vmem:[%s4036_s12 + $0xe48] sm:$0xff] }
  0x87   : > { %v690_v38 = vld [vmem:[%s4036_s12 + $0xe60] sm:$0xff]  ;;  %687 = vst [vmem:[%s4041_s13 + $0x720] sm:$0xff] %v686_v36  ;;  %689 = vst [vmem:[%s4041_s13 + $0x728] sm:$0xff] %v688_v37  ;;  %v692_v39 = vld [vmem:[%s4036_s12 + $0xe68] sm:$0xff] }
  0x88   : > { %691 = vst [vmem:[%s4041_s13 + $0x730] sm:$0xff] %v690_v38  ;;  %v694_v40 = vld [vmem:[%s4036_s12 + $0xe80] sm:$0xff]  ;;  %v696_v41 = vld [vmem:[%s4036_s12 + $0xe88] sm:$0xff]  ;;  %693 = vst [vmem:[%s4041_s13 + $0x738] sm:$0xff] %v692_v39 }
  0x89   : > { %695 = vst [vmem:[%s4041_s13 + $0x740] sm:$0xff] %v694_v40  ;;  %697 = vst [vmem:[%s4041_s13 + $0x748] sm:$0xff] %v696_v41  ;;  %v698_v42 = vld [vmem:[%s4036_s12 + $0xea0] sm:$0xff]  ;;  %v700_v43 = vld [vmem:[%s4036_s12 + $0xea8] sm:$0xff] }
  0x8a   : > { %v702_v44 = vld [vmem:[%s4036_s12 + $0xec0] sm:$0xff]  ;;  %699 = vst [vmem:[%s4041_s13 + $0x750] sm:$0xff] %v698_v42  ;;  %701 = vst [vmem:[%s4041_s13 + $0x758] sm:$0xff] %v700_v43  ;;  %v704_v45 = vld [vmem:[%s4036_s12 + $0xec8] sm:$0xff] }
  0x8b   : > { %703 = vst [vmem:[%s4041_s13 + $0x760] sm:$0xff] %v702_v44  ;;  %v706_v46 = vld [vmem:[%s4036_s12 + $0xee0] sm:$0xff]  ;;  %v708_v47 = vld [vmem:[%s4036_s12 + $0xee8] sm:$0xff]  ;;  %705 = vst [vmem:[%s4041_s13 + $0x768] sm:$0xff] %v704_v45 }
  0x8c   : > { %707 = vst [vmem:[%s4041_s13 + $0x770] sm:$0xff] %v706_v46  ;;  %709 = vst [vmem:[%s4041_s13 + $0x778] sm:$0xff] %v708_v47  ;;  %v710_v48 = vld [vmem:[%s4036_s12 + $0xf00] sm:$0xff]  ;;  %v712_v49 = vld [vmem:[%s4036_s12 + $0xf08] sm:$0xff] }
  0x8d   : > { %v714_v50 = vld [vmem:[%s4036_s12 + $0xf20] sm:$0xff]  ;;  %711 = vst [vmem:[%s4041_s13 + $0x780] sm:$0xff] %v710_v48  ;;  %713 = vst [vmem:[%s4041_s13 + $0x788] sm:$0xff] %v712_v49  ;;  %v716_v51 = vld [vmem:[%s4036_s12 + $0xf28] sm:$0xff] }
  0x8e   : > { %715 = vst [vmem:[%s4041_s13 + $0x790] sm:$0xff] %v714_v50  ;;  %v718_v52 = vld [vmem:[%s4036_s12 + $0xf40] sm:$0xff]  ;;  %v720_v53 = vld [vmem:[%s4036_s12 + $0xf48] sm:$0xff]  ;;  %717 = vst [vmem:[%s4041_s13 + $0x798] sm:$0xff] %v716_v51 }
  0x8f   : > { %719 = vst [vmem:[%s4041_s13 + $0x7a0] sm:$0xff] %v718_v52  ;;  %721 = vst [vmem:[%s4041_s13 + $0x7a8] sm:$0xff] %v720_v53  ;;  %v722_v54 = vld [vmem:[%s4036_s12 + $0xf60] sm:$0xff]  ;;  %v724_v55 = vld [vmem:[%s4036_s12 + $0xf68] sm:$0xff] }
  0x90   : > { %v726_v56 = vld [vmem:[%s4036_s12 + $0xf80] sm:$0xff]  ;;  %723 = vst [vmem:[%s4041_s13 + $0x7b0] sm:$0xff] %v722_v54  ;;  %725 = vst [vmem:[%s4041_s13 + $0x7b8] sm:$0xff] %v724_v55  ;;  %v728_v57 = vld [vmem:[%s4036_s12 + $0xf88] sm:$0xff] }
  0x91   : > { %727 = vst [vmem:[%s4041_s13 + $0x7c0] sm:$0xff] %v726_v56  ;;  %v730_v58 = vld [vmem:[%s4036_s12 + $0xfa0] sm:$0xff]  ;;  %v732_v59 = vld [vmem:[%s4036_s12 + $0xfa8] sm:$0xff]  ;;  %729 = vst [vmem:[%s4041_s13 + $0x7c8] sm:$0xff] %v728_v57 }
  0x92   : > { %731 = vst [vmem:[%s4041_s13 + $0x7d0] sm:$0xff] %v730_v58  ;;  %733 = vst [vmem:[%s4041_s13 + $0x7d8] sm:$0xff] %v732_v59  ;;  %v734_v60 = vld [vmem:[%s4036_s12 + $0xfc0] sm:$0xff]  ;;  %v736_v61 = vld [vmem:[%s4036_s12 + $0xfc8] sm:$0xff] }
  0x93   : > { %v738_v62 = vld [vmem:[%s4036_s12 + $0xfe0] sm:$0xff]  ;;  %735 = vst [vmem:[%s4041_s13 + $0x7e0] sm:$0xff] %v734_v60  ;;  %737 = vst [vmem:[%s4041_s13 + $0x7e8] sm:$0xff] %v736_v61  ;;  %v740_v63 = vld [vmem:[%s4036_s12 + $0xfe8] sm:$0xff] }
  0x94   : > { %739 = vst [vmem:[%s4041_s13 + $0x7f0] sm:$0xff] %v738_v62  ;;  %741 = vst [vmem:[%s4041_s13 + $0x7f8] sm:$0xff] %v740_v63 }
  0x95 PF: > { %747 = sbr.rel (!%p4020_p4) target bundleno = 157 (0x9d), region = 55  ;;  %s749_s14 = sand.u32 (%p4020_p4), 1, %s3943_s22  }
  0x96   : > { %s3467_s15 = sshll.u32 (%p4020_p4), %s3947_s23, 5  ;;  %s3183_s16 = sshll.u32 (%p4020_p4), %s749_s14, 6 }
  0x97   : > { %s754_s19 = scalar_lea.vmem (%p4020_p4), %s5173_s3, %s3467_s15  ;;  %s751_s20 = scalar_lea.vmem (%p4020_p4), [#allocation3], %s3183_s16 }
  0x98   : > { %v767_v0 = vld [vmem:[%s754_s19] sm:$0xff] (%p4020_p4)  ;;  %v769_v1 = vld [vmem:[%s754_s19 + $0x8] sm:$0xff] (%p4020_p4)  ;;  %v771_v2 = vld [vmem:[%s754_s19 + $0x10] sm:$0xff] (%p4020_p4) }
  0x99   : > { %768 = vst [vmem:[%s751_s20] sm:$0xff] (%p4020_p4), %v767_v0  ;;  %770 = vst [vmem:[%s751_s20 + $0x8] sm:$0xff] (%p4020_p4), %v769_v1  ;;  %v773_v3 = vld [vmem:[%s754_s19 + $0x18] sm:$0xff] (%p4020_p4)  ;;  %v775_v4 = vld [vmem:[%s754_s19 + $0x40] sm:$0xff] (%p4020_p4) }
  0x9a   : > { %772 = vst [vmem:[%s751_s20 + $0x10] sm:$0xff] (%p4020_p4), %v771_v2  ;;  %v777_v5 = vld [vmem:[%s754_s19 + $0x48] sm:$0xff] (%p4020_p4)  ;;  %774 = vst [vmem:[%s751_s20 + $0x18] sm:$0xff] (%p4020_p4), %v773_v3  ;;  %v779_v6 = vld [vmem:[%s754_s19 + $0x50] sm:$0xff] (%p4020_p4) }
  0x9b   : > { %776 = vst [vmem:[%s751_s20 + $0x20] sm:$0xff] (%p4020_p4), %v775_v4  ;;  %778 = vst [vmem:[%s751_s20 + $0x28] sm:$0xff] (%p4020_p4), %v777_v5  ;;  %v781_v7 = vld [vmem:[%s754_s19 + $0x58] sm:$0xff] (%p4020_p4) }
  0x9c   : > { %780 = vst [vmem:[%s751_s20 + $0x30] sm:$0xff] %v779_v6  ;;  %782 = vst [vmem:[%s751_s20 + $0x38] sm:$0xff] %v781_v7 }
  0x9d PF: > { %p3186_p7 = scmp.ge.s32.totalorder %s3947_s23, 1  ;;  %p787_p8 = scmp.lt.s32.totalorder %s3947_s23, 3 }
  0x9f   : > { %p788_p9 = pnand %p3186_p7, %p787_p8 }
  0xa0   : > { %v841_v8 = vld [vmem:[%s5174_s4] sm:$0xff] (!%p788_p9)  ;;  %s794_s29 = sand.u32 (!%p788_p9), 1, %s3939_s21   ;;  %v3949_v9 = vmov (!%p788_p9), 1   ;;  %v3950_v10 = vmov (!%p788_p9), 0   ;;  %v842_v11 = vld [vmem:[%s5174_s4 + $0x8] sm:$0xff] (!%p788_p9)  ;;  %v3951_v21 = vmov (!%p788_p9), 2  }
  0xa1   : > { %791 = sbr.rel (%p788_p9) target bundleno = 741 (0x2e5), region = 78  ;;  %3532 = vset.pattern.permute.xlu1 (!%p788_p9), %v3949_v9  ;;  %3531 = vset.pattern.permute.xlu0 (!%p788_p9), %v3950_v10  ;;  %s3187_s7 = sshll.u32 (!%p788_p9), %s794_s29, 11 }
  0xa2   : > { %902 = vperm.xlu1 (!%p788_p9), %3532, %v841_v8   ;;  %861 = vperm.xlu0 (!%p788_p9), %3531, %v841_v8   ;;  %s4570_s23 = scalar_lea.vmem (!%p788_p9), [#allocation2], %s3187_s7  ;;  %s3447_s18 = sshll.u32 (!%p788_p9), %s4005_s24, 9 }
  0xa3   : > { %v3539_v12 = vld [vmem:[%s4570_s23 + $0x4] ss:$16 sps:$4 sm:$0xff] (!%p788_p9)   ;;  %v3541_v13 = vld [vmem:[%s4570_s23 + $0xc] ss:$16 sps:$4 sm:$0xff] (!%p788_p9)   ;;  %v3543_v14 = vld [vmem:[%s4570_s23] ss:$16 sps:$4 sm:$0xff] (!%p788_p9)  }
  0xa4   : > { %2493 = vmatprep.subr.bf16.mxu0 (!%p788_p9), %v3539_v12  ;;  %v3544_v15 = vld [vmem:[%s4570_s23 + $0x8] ss:$16 sps:$4 sm:$0xff] (!%p788_p9)   ;;  %v3545_v16 = vld [vmem:[%s4570_s23 + $0x24] ss:$16 sps:$4 sm:$0xff] (!%p788_p9)   ;;  %2665 = vmatprep.subr.bf16.mxu1 (!%p788_p9), %v3541_v13  ;;  %v3547_v17 = vld [vmem:[%s4570_s23 + $0x2c] ss:$16 sps:$4 sm:$0xff] (!%p788_p9)  }
  0xa5   : > { %2494 = vmatpush1.bf16.msra.mxu0 (!%p788_p9), %v3543_v14  ;;  %v3549_v18 = vld [vmem:[%s4570_s23 + $0x20] ss:$16 sps:$4 sm:$0xff] (!%p788_p9)   ;;  %2666 = vmatpush1.bf16.msra.mxu1 (!%p788_p9), %v3544_v15  ;;  %v3550_v19 = vld [vmem:[%s4570_s23 + $0x28] ss:$16 sps:$4 sm:$0xff] (!%p788_p9)   ;;  %v3551_v20 = vld [vmem:[%s4570_s23 + $0x44] ss:$16 sps:$4 sm:$0xff] (!%p788_p9)  }
  0xa6   : > { %906 = vperm.xlu1 (!%p788_p9), %3532, %v842_v11   ;;  %866 = vperm.xlu0 (!%p788_p9), %3531, %v842_v11   ;;  %v3553_v22 = vld [vmem:[%s4570_s23 + $0x4c] ss:$16 sps:$4 sm:$0xff] (!%p788_p9)   ;;  %v3555_v23 = vld [vmem:[%s4570_s23 + $0x40] ss:$16 sps:$4 sm:$0xff] (!%p788_p9)   ;;  %v3556_v24 = vld [vmem:[%s4570_s23 + $0x48] ss:$16 sps:$4 sm:$0xff] (!%p788_p9)  }
  0xa7   : > { %2495 = vmatprep.subr.bf16.mxu0 (!%p788_p9), %v3545_v16  ;;  %2667 = vmatprep.subr.bf16.mxu1 (!%p788_p9), %v3547_v17  ;;  %v3557_v25 = vld [vmem:[%s4570_s23 + $0x64] ss:$16 sps:$4 sm:$0xff] (!%p788_p9)   ;;  %v3559_v26 = vld [vmem:[%s4570_s23 + $0x6c] ss:$16 sps:$4 sm:$0xff] (!%p788_p9)   ;;  %v3561_v27 = vld [vmem:[%s4570_s23 + $0x60] ss:$16 sps:$4 sm:$0xff] (!%p788_p9)  }
  0xa8   : > { %v3562_v28 = vld [vmem:[%s4570_s23 + $0x68] ss:$16 sps:$4 sm:$0xff]   ;;  %v3563_v29 = vld [vmem:[%s4570_s23 + $0x84] ss:$16 sps:$4 sm:$0xff]   ;;  %v3565_v30 = vld [vmem:[%s4570_s23 + $0x8c] ss:$16 sps:$4 sm:$0xff]  }
  0xa9   : > { %2496 = vmatpush1.bf16.msra.mxu0 %v3549_v18  ;;  %2668 = vmatpush1.bf16.msra.mxu1 %v3550_v19  ;;  %v3567_v31 = vld [vmem:[%s4570_s23 + $0x80] ss:$16 sps:$4 sm:$0xff]   ;;  %v3568_v32 = vld [vmem:[%s4570_s23 + $0x88] ss:$16 sps:$4 sm:$0xff]   ;;  %v3569_v33 = vld [vmem:[%s4570_s23 + $0xa4] ss:$16 sps:$4 sm:$0xff]  }
  0xaa   : > { %3534 = vset.pattern.permute.xlu1 %v3951_v21  ;;  %3533 = vset.pattern.permute.xlu0 %v3951_v21  ;;  %v3571_v34 = vld [vmem:[%s4570_s23 + $0xac] ss:$16 sps:$4 sm:$0xff]   ;;  %v3573_v35 = vld [vmem:[%s4570_s23 + $0xa0] ss:$16 sps:$4 sm:$0xff]   ;;  %v3574_v36 = vld [vmem:[%s4570_s23 + $0xa8] ss:$16 sps:$4 sm:$0xff]  }
  0xab   : > { %2905 = vperm.xlu1 %3534, %v842_v11   ;;  %2901 = vperm.xlu0 %3533, %v841_v8   ;;  %v3575_v37 = vld [vmem:[%s4570_s23 + $0xc4] ss:$16 sps:$4 sm:$0xff]   ;;  %v3577_v38 = vld [vmem:[%s4570_s23 + $0xcc] ss:$16 sps:$4 sm:$0xff]   ;;  %v3579_v39 = vld [vmem:[%s4570_s23 + $0xc0] ss:$16 sps:$4 sm:$0xff]  }
  0xac   : > { %2497 = vmatprep.subr.bf16.mxu0 %v3551_v20  ;;  %2669 = vmatprep.subr.bf16.mxu1 %v3553_v22  ;;  %v3580_v40 = vld [vmem:[%s4570_s23 + $0xc8] ss:$16 sps:$4 sm:$0xff]   ;;  %v3581_v41 = vld [vmem:[%s4570_s23 + $0xe4] ss:$16 sps:$4 sm:$0xff]   ;;  %v3583_v42 = vld [vmem:[%s4570_s23 + $0xec] ss:$16 sps:$4 sm:$0xff]  }
  0xad   : > { %2498 = vmatpush1.bf16.msra.mxu0 %v3555_v23  ;;  %2670 = vmatpush1.bf16.msra.mxu1 %v3556_v24  ;;  %v3585_v43 = vld [vmem:[%s4570_s23 + $0xe0] ss:$16 sps:$4 sm:$0xff]   ;;  %v3586_v44 = vld [vmem:[%s4570_s23 + $0xe8] ss:$16 sps:$4 sm:$0xff]   ;;  %v3587_v45 = vld [vmem:[%s4570_s23 + $0x104] ss:$16 sps:$4 sm:$0xff]  }
  0xae   : > { %2499 = vmatprep.subr.bf16.mxu0 %v3557_v25  ;;  %2671 = vmatprep.subr.bf16.mxu1 %v3559_v26  ;;  %v3589_v46 = vld [vmem:[%s4570_s23 + $0x10c] ss:$16 sps:$4 sm:$0xff]   ;;  %v3591_v47 = vld [vmem:[%s4570_s23 + $0x100] ss:$16 sps:$4 sm:$0xff]   ;;  %v3592_v48 = vld [vmem:[%s4570_s23 + $0x108] ss:$16 sps:$4 sm:$0xff]  }
  0xaf   : > { %v3593_v49 = vld [vmem:[%s4570_s23 + $0x124] ss:$16 sps:$4 sm:$0xff]   ;;  %v3595_v50 = vld [vmem:[%s4570_s23 + $0x12c] ss:$16 sps:$4 sm:$0xff]   ;;  %v3597_v51 = vld [vmem:[%s4570_s23 + $0x120] ss:$16 sps:$4 sm:$0xff]  }
  0xb0   : > { %v3598_v52 = vld [vmem:[%s4570_s23 + $0x128] ss:$16 sps:$4 sm:$0xff]   ;;  %v3599_v53 = vld [vmem:[%s4570_s23 + $0x144] ss:$16 sps:$4 sm:$0xff]   ;;  %v3601_v54 = vld [vmem:[%s4570_s23 + $0x14c] ss:$16 sps:$4 sm:$0xff]  }
  0xb1   : > { %2500 = vmatpush1.bf16.msra.mxu0 %v3561_v27  ;;  %2672 = vmatpush1.bf16.msra.mxu1 %v3562_v28  ;;  %v3603_v55 = vld [vmem:[%s4570_s23 + $0x140] ss:$16 sps:$4 sm:$0xff]   ;;  %v3604_v56 = vld [vmem:[%s4570_s23 + $0x148] ss:$16 sps:$4 sm:$0xff]   ;;  %v3605_v57 = vld [vmem:[%s4570_s23 + $0x164] ss:$16 sps:$4 sm:$0xff]  }
  0xb2   : > { %2501 = vmatprep.subr.bf16.mxu0 %v3563_v29  ;;  %2673 = vmatprep.subr.bf16.mxu1 %v3565_v30  ;;  %v3607_v58 = vld [vmem:[%s4570_s23 + $0x16c] ss:$16 sps:$4 sm:$0xff]   ;;  %v3609_v59 = vld [vmem:[%s4570_s23 + $0x160] ss:$16 sps:$4 sm:$0xff]   ;;  %v3610_v60 = vld [vmem:[%s4570_s23 + $0x168] ss:$16 sps:$4 sm:$0xff]  }
  0xb3   : > { %v3611_v61 = vld [vmem:[%s4570_s23 + $0x184] ss:$16 sps:$4 sm:$0xff]   ;;  %v3613_v62 = vld [vmem:[%s4570_s23 + $0x18c] ss:$16 sps:$4 sm:$0xff]   ;;  %v3615_v63 = vld [vmem:[%s4570_s23 + $0x180] ss:$16 sps:$4 sm:$0xff]  }
  0xb4   : > { %v3616_v0 = vld [vmem:[%s4570_s23 + $0x188] ss:$16 sps:$4 sm:$0xff]   ;;  %v3617_v1 = vld [vmem:[%s4570_s23 + $0x1a4] ss:$16 sps:$4 sm:$0xff]   ;;  %v3619_v2 = vld [vmem:[%s4570_s23 + $0x1ac] ss:$16 sps:$4 sm:$0xff]  }
  0xb5   : > { %2502 = vmatpush1.bf16.msra.mxu0 %v3567_v31  ;;  %2674 = vmatpush1.bf16.msra.mxu1 %v3568_v32  ;;  %v3621_v3 = vld [vmem:[%s4570_s23 + $0x1a0] ss:$16 sps:$4 sm:$0xff]   ;;  %v3622_v4 = vld [vmem:[%s4570_s23 + $0x1a8] ss:$16 sps:$4 sm:$0xff]   ;;  %v3623_v5 = vld [vmem:[%s4570_s23 + $0x1c4] ss:$16 sps:$4 sm:$0xff]  }
  0xb6   : > { %2503 = vmatprep.subr.bf16.mxu0 %v3569_v33  ;;  %2675 = vmatprep.subr.bf16.mxu1 %v3571_v34  ;;  %v3625_v6 = vld [vmem:[%s4570_s23 + $0x1cc] ss:$16 sps:$4 sm:$0xff]   ;;  %v3627_v7 = vld [vmem:[%s4570_s23 + $0x1c0] ss:$16 sps:$4 sm:$0xff]   ;;  %v3628_v8 = vld [vmem:[%s4570_s23 + $0x1c8] ss:$16 sps:$4 sm:$0xff]  }
  0xb7   : > { %v3629_v9 = vld [vmem:[%s4570_s23 + $0x1e4] ss:$16 sps:$4 sm:$0xff]   ;;  %v3631_v10 = vld [vmem:[%s4570_s23 + $0x1ec] ss:$16 sps:$4 sm:$0xff]   ;;  %v3633_v11 = vld [vmem:[%s4570_s23 + $0x1e0] ss:$16 sps:$4 sm:$0xff]  }
  0xb8   : > { %v3634_v12 = vld [vmem:[%s4570_s23 + $0x1e8] ss:$16 sps:$4 sm:$0xff]   ;;  %v3637_v13 = vld [vmem:[%s4570_s23 + $0x204] ss:$16 sps:$4 sm:$0xff]   ;;  %v3640_v14 = vld [vmem:[%s4570_s23 + $0x20c] ss:$16 sps:$4 sm:$0xff]  }
  0xb9   : > { %2504 = vmatpush1.bf16.msra.mxu0 %v3573_v35  ;;  %2676 = vmatpush1.bf16.msra.mxu1 %v3574_v36  ;;  %v844_v15 = vld [vmem:[%s5170_s0 + $0x8] sm:$0xff]  ;;  %v843_v17 = vld [vmem:[%s5170_s0] sm:$0xff]  ;;  %v846_v19 = vld [vmem:[%s5170_s0 + $0x18] sm:$0xff]  ;;  %s2838_s19 = sshra.s32 %s3447_s18, 7  ;;  %s5075_s7 = sshll.u32 %s794_s29, 6 }
  0xba   : > { %2505 = vmatprep.subr.bf16.mxu0 %v3575_v37  ;;  %2677 = vmatprep.subr.bf16.mxu1 %v3577_v38  ;;  %v886_v16 = vld [vmem:[%s5171_s1 + $0x8] sm:$0xff]  ;;  %v885_v18 = vld [vmem:[%s5171_s1] sm:$0xff]  ;;  %v888_v20 = vld [vmem:[%s5171_s1 + $0x18] sm:$0xff]  ;;  %s3448_s20 = sshll.u32 %s2838_s19, 3  ;;  %s5080_s8 = scalar_lea.vmem [#allocation3], %s5075_s7 }
  0xbb   : > { %v845_v21 = vld [vmem:[%s5170_s0 + $0x10] sm:$0xff]  ;;  %v852_v25 = vld [vmem:[%s5170_s0 + $0x48] sm:$0xff]  ;;  %v851_v27 = vld [vmem:[%s5170_s0 + $0x40] sm:$0xff]  ;;  %s4810_s11 = scalar_lea.vmem %s5170_s0, %s3448_s20  ;;  %s4815_s14 = scalar_lea.vmem %s5171_s1, %s3448_s20 }
  0xbc   : > { %v887_v22 = vld [vmem:[%s5171_s1 + $0x10] sm:$0xff]  ;;  %v894_v26 = vld [vmem:[%s5171_s1 + $0x48] sm:$0xff]  ;;  %v893_v28 = vld [vmem:[%s5171_s1 + $0x40] sm:$0xff]  ;;  %s5099_s21 = scalar_lea.vmem [#allocation4], %s5075_s7  ;;  %s5103_s29 = scalar_lea.vmem [#allocation5], %s5075_s7 }
  0xbd   : > { %2506 = vmatpush1.bf16.msra.mxu0 %v3579_v39  ;;  %2678 = vmatpush1.bf16.msra.mxu1 %v3580_v40  ;;  %v848_v29 = vld [vmem:[%s5170_s0 + $0x28] sm:$0xff]  ;;  %v854_v34 = vld [vmem:[%s5170_s0 + $0x58] sm:$0xff]  ;;  %v853_v39 = vld [vmem:[%s5170_s0 + $0x50] sm:$0xff] }
  0xbe   : > { %2507 = vmatprep.subr.bf16.mxu0 %v3581_v41  ;;  %2679 = vmatprep.subr.bf16.mxu1 %v3583_v42  ;;  %v896_v35 = vld [vmem:[%s5171_s1 + $0x58] sm:$0xff]  ;;  %v890_v36 = vld [vmem:[%s5171_s1 + $0x28] sm:$0xff]  ;;  %v895_v41 = vld [vmem:[%s5171_s1 + $0x50] sm:$0xff] }
  0xc1   : > { %2508 = vmatpush1.bf16.msra.mxu0 %v3585_v43  ;;  %2680 = vmatpush1.bf16.msra.mxu1 %v3586_v44 }
  0xc2   : > { %2509 = vmatprep.subr.bf16.mxu0 %v3587_v45  ;;  %2681 = vmatprep.subr.bf16.mxu1 %v3589_v46  ;;  %v856_v45 = vld [vmem:[%s5170_s0 + $0x68] sm:$0xff] }
  0xc3   : > { %v898_v46 = vld [vmem:[%s5171_s1 + $0x68] sm:$0xff] }
  0xc5   : > { %2510 = vmatpush1.bf16.msra.mxu0 %v3591_v47  ;;  %2682 = vmatpush1.bf16.msra.mxu1 %v3592_v48 }
  0xc6   : > { %2511 = vmatprep.subr.bf16.mxu0 %v3593_v49  ;;  %2683 = vmatprep.subr.bf16.mxu1 %v3595_v50 }
  0xc9   : > { %2512 = vmatpush1.bf16.msra.mxu0 %v3597_v51  ;;  %2684 = vmatpush1.bf16.msra.mxu1 %v3598_v52 }
  0xca   : > { %2513 = vmatprep.subr.bf16.mxu0 %v3599_v53  ;;  %2685 = vmatprep.subr.bf16.mxu1 %v3601_v54 }
  0xcd   : > { %2514 = vmatpush1.bf16.msra.mxu0 %v3603_v55  ;;  %2686 = vmatpush1.bf16.msra.mxu1 %v3604_v56 }
  0xce   : > { %2515 = vmatprep.subr.bf16.mxu0 %v3605_v57  ;;  %2687 = vmatprep.subr.bf16.mxu1 %v3607_v58  ;;  %v847_v57 = vld [vmem:[%s5170_s0 + $0x20] sm:$0xff] }
  0xd1   : > { %2516 = vmatpush1.bf16.msra.mxu0 %v3609_v59  ;;  %2688 = vmatpush1.bf16.msra.mxu1 %v3610_v60 }
  0xd2   : > { %2517 = vmatprep.subr.bf16.mxu0 %v3611_v61  ;;  %2689 = vmatprep.subr.bf16.mxu1 %v3613_v62  ;;  %v855_v62 = vld [vmem:[%s5170_s0 + $0x60] sm:$0xff] }
  0xd5   : > { %2518 = vmatpush1.bf16.msra.mxu0 %v3615_v63  ;;  %2690 = vmatpush1.bf16.msra.mxu1 %v3616_v0  ;;  %v3635_v0 = vld [vmem:[%s4570_s23 + $0x200] ss:$16 sps:$4 sm:$0xff]  }
  0xd6   : > { %2519 = vmatprep.subr.bf16.mxu0 %v3617_v1  ;;  %2691 = vmatprep.subr.bf16.mxu1 %v3619_v2  ;;  %v3638_v1 = vld [vmem:[%s4570_s23 + $0x208] ss:$16 sps:$4 sm:$0xff]  }
  0xd9   : > { %2520 = vmatpush1.bf16.msra.mxu0 %v3621_v3  ;;  %2692 = vmatpush1.bf16.msra.mxu1 %v3622_v4 }
  0xda   : > { %2521 = vmatprep.subr.bf16.mxu0 %v3623_v5  ;;  %2693 = vmatprep.subr.bf16.mxu1 %v3625_v6  ;;  %v889_v5 = vld [vmem:[%s5171_s1 + $0x20] sm:$0xff] }
  0xdb   : > { %v897_v6 = vld [vmem:[%s5171_s1 + $0x60] sm:$0xff] }
  0xdd   : > { %2522 = vmatpush1.bf16.msra.mxu0 %v3627_v7  ;;  %2694 = vmatpush1.bf16.msra.mxu1 %v3628_v8 }
  0xde   : > { %2523 = vmatprep.subr.bf16.mxu0 %v3629_v9  ;;  %2695 = vmatprep.subr.bf16.mxu1 %v3631_v10 }
  0xe1   : > { %2524 = vmatpush1.bf16.msra.mxu0 %v3633_v11  ;;  %2696 = vmatpush1.bf16.msra.mxu1 %v3634_v12 }
  0xe2   : > { %2536 = vmatprep.subr.bf16.mxu0 %v3637_v13  ;;  %2708 = vmatprep.subr.bf16.mxu1 %v3640_v14  ;;  %v3643_v13 = vld [vmem:[%s4570_s23 + $0x224] ss:$16 sps:$4 sm:$0xff]   ;;  %v3646_v14 = vld [vmem:[%s4570_s23 + $0x22c] ss:$16 sps:$4 sm:$0xff]  }
 0x121   : > { %v4662_v23 = vpop.permute.xlu1 %902  ;;  %v4664_v24 = vpop.permute.xlu0 %861 }
 0x122   : > { %v870_v30 = vmul.f32 %v4664_v24, %v844_v15  ;;  %v910_v31 = vmul.f32 %v4662_v23, %v886_v16  ;;  %v869_v32 = vmul.f32 %v4664_v24, %v843_v17  ;;  %v909_v33 = vmul.f32 %v4662_v23, %v885_v18  ;;  %v850_v17 = vld [vmem:[%s5170_s0 + $0x38] sm:$0xff] }
 0x123   : > { %v872_v37 = vmul.f32 %v4664_v24, %v846_v19  ;;  %v912_v38 = vmul.f32 %v4662_v23, %v888_v20  ;;  %v871_v40 = vmul.f32 %v4664_v24, %v845_v21  ;;  %v911_v42 = vmul.f32 %v4662_v23, %v887_v22  ;;  %v858_v18 = vld [vmem:[%s5170_s0 + $0x78] sm:$0xff] }
 0x124   : > { %v926_v43 = vadd.f32 %v910_v31, %v870_v30  ;;  %v925_v44 = vadd.f32 %v909_v33, %v869_v32  ;;  %v874_v51 = vmul.f32 %v4664_v24, %v848_v29  ;;  %v914_v52 = vmul.f32 %v4662_v23, %v890_v36  ;;  %v3641_v30 = vld [vmem:[%s4570_s23 + $0x220] ss:$16 sps:$4 sm:$0xff]   ;;  %v3644_v31 = vld [vmem:[%s4570_s23 + $0x228] ss:$16 sps:$4 sm:$0xff]   ;;  %v3652_v36 = vld [vmem:[%s4570_s23 + $0x24c] ss:$16 sps:$4 sm:$0xff]  }
 0x125   : > { %v4710_v47 = vpop.permute.xlu1 %906  ;;  %v4712_v48 = vpop.permute.xlu0 %866  ;;  %v928_v49 = vadd.f32 %v912_v38, %v872_v37  ;;  %v927_v50 = vadd.f32 %v911_v42, %v871_v40  ;;  %v873_v10 = vmul.f32 %v4664_v24, %v847_v57  ;;  %v913_v21 = vmul.f32 %v4662_v23, %v889_v5  ;;  %v3647_v40 = vld [vmem:[%s4570_s23 + $0x240] ss:$16 sps:$4 sm:$0xff]   ;;  %v3650_v42 = vld [vmem:[%s4570_s23 + $0x248] ss:$16 sps:$4 sm:$0xff]  }
 0x126   : > { %v878_v53 = vmul.f32 %v4712_v48, %v852_v25  ;;  %v918_v54 = vmul.f32 %v4710_v47, %v894_v26  ;;  %v877_v55 = vmul.f32 %v4712_v48, %v851_v27  ;;  %v917_v56 = vmul.f32 %v4710_v47, %v893_v28  ;;  %v892_v25 = vld [vmem:[%s5171_s1 + $0x38] sm:$0xff] }
 0x127   : > { %v880_v58 = vmul.f32 %v4712_v48, %v854_v34  ;;  %v920_v59 = vmul.f32 %v4710_v47, %v896_v35  ;;  %v879_v60 = vmul.f32 %v4712_v48, %v853_v39  ;;  %v919_v61 = vmul.f32 %v4710_v47, %v895_v41  ;;  %v900_v26 = vld [vmem:[%s5171_s1 + $0x78] sm:$0xff]  ;;  %v3649_v35 = vld [vmem:[%s4570_s23 + $0x244] ss:$16 sps:$4 sm:$0xff]  }
 0x128   : > { %v934_v63 = vadd.f32 %v918_v54, %v878_v53  ;;  %v933_v2 = vadd.f32 %v917_v56, %v877_v55  ;;  %v882_v3 = vmul.f32 %v4712_v48, %v856_v45  ;;  %v922_v4 = vmul.f32 %v4710_v47, %v898_v46  ;;  %v3658_v45 = vld [vmem:[%s4570_s23 + $0x26c] ss:$16 sps:$4 sm:$0xff]   ;;  %v3653_v46 = vld [vmem:[%s4570_s23 + $0x260] ss:$16 sps:$4 sm:$0xff]   ;;  %v3662_v53 = vld [vmem:[%s4570_s23 + $0x288] ss:$16 sps:$4 sm:$0xff]  }
 0x129   : > { %v936_v7 = vadd.f32 %v920_v59, %v880_v58  ;;  %v935_v8 = vadd.f32 %v919_v61, %v879_v60  ;;  %v930_v9 = vadd.f32 %v914_v52, %v874_v51  ;;  %v881_v16 = vmul.f32 %v4712_v48, %v855_v62  ;;  %v3664_v51 = vld [vmem:[%s4570_s23 + $0x28c] ss:$16 sps:$4 sm:$0xff]   ;;  %v3659_v52 = vld [vmem:[%s4570_s23 + $0x280] ss:$16 sps:$4 sm:$0xff]   ;;  %v3667_v54 = vld [vmem:[%s4570_s23 + $0x2a4] ss:$16 sps:$4 sm:$0xff]  }
 0x12a   : > { %v942_v11 = vpack.c.bf16 %v934_v63, %v926_v43  ;;  %v941_v12 = vpack.c.bf16 %v933_v2, %v925_v44  ;;  %v938_v15 = vadd.f32 %v922_v4, %v882_v3  ;;  %v921_v22 = vmul.f32 %v4710_v47, %v897_v6  ;;  %v3655_v44 = vld [vmem:[%s4570_s23 + $0x264] ss:$16 sps:$4 sm:$0xff]   ;;  %v3670_v55 = vld [vmem:[%s4570_s23 + $0x2ac] ss:$16 sps:$4 sm:$0xff]   ;;  %v3665_v56 = vld [vmem:[%s4570_s23 + $0x2a0] ss:$16 sps:$4 sm:$0xff]  }
 0x12b   : > { %v944_v19 = vpack.c.bf16 %v936_v7, %v928_v49  ;;  %v4750_v20 = vpack.c.bf16 %v935_v8, %v927_v50  ;;  %v876_v28 = vmul.f32 %v4664_v24, %v850_v17  ;;  %v884_v29 = vmul.f32 %v4712_v48, %v858_v18  ;;  %v3656_v49 = vld [vmem:[%s4570_s23 + $0x268] ss:$16 sps:$4 sm:$0xff]   ;;  %v3661_v50 = vld [vmem:[%s4570_s23 + $0x284] ss:$16 sps:$4 sm:$0xff]   ;;  %v3676_v59 = vld [vmem:[%s4570_s23 + $0x2cc] ss:$16 sps:$4 sm:$0xff]  }
 0x12c   : > { %2525 = vmatprep.mubr.bf16.mxu0 %v942_v11  ;;  %2697 = vmatprep.mubr.bf16.mxu1 %v942_v11  ;;  %v4760_v27 = vpack.c.bf16 %v938_v15, %v930_v9  ;;  %v929_v32 = vadd.f32 %v913_v21, %v873_v10  ;;  %v937_v33 = vadd.f32 %v921_v22, %v881_v16  ;;  %v3668_v57 = vld [vmem:[%s4570_s23 + $0x2a8] ss:$16 sps:$4 sm:$0xff]   ;;  %v3673_v58 = vld [vmem:[%s4570_s23 + $0x2c4] ss:$16 sps:$4 sm:$0xff]   ;;  %v3671_v60 = vld [vmem:[%s4570_s23 + $0x2c0] ss:$16 sps:$4 sm:$0xff]  }
 0x12d   : > { %2526 = vmatmul.mubr.bf16.vlgmr.msra.gmra.mrb[0].mxu0 %v941_v12  ;;  %2698 = vmatmul.mubr.bf16.vlgmr.msra.gmra.mrb[0].mxu1 %v941_v12  ;;  %v916_v34 = vmul.f32 %v4662_v23, %v892_v25  ;;  %v924_v37 = vmul.f32 %v4710_v47, %v900_v26  ;;  %v3674_v61 = vld [vmem:[%s4570_s23 + $0x2c8] ss:$16 sps:$4 sm:$0xff]   ;;  %v3679_v62 = vld [vmem:[%s4570_s23 + $0x2e4] ss:$16 sps:$4 sm:$0xff]   ;;  %v3682_v63 = vld [vmem:[%s4570_s23 + $0x2ec] ss:$16 sps:$4 sm:$0xff]  }
 0x12e   : > { %2537 = vmatpush1.bf16.msra.mxu0 %v3635_v0  ;;  %2709 = vmatpush1.bf16.msra.mxu1 %v3638_v1  ;;  %v4770_v38 = vpack.c.bf16 %v937_v33, %v929_v32  ;;  %v3677_v0 = vld [vmem:[%s4570_s23 + $0x2e0] ss:$16 sps:$4 sm:$0xff]   ;;  %v3680_v1 = vld [vmem:[%s4570_s23 + $0x2e8] ss:$16 sps:$4 sm:$0xff]   ;;  %v3685_v2 = vld [vmem:[%s4570_s23 + $0x304] ss:$16 sps:$4 sm:$0xff]  }
 0x12f   : > { %2568 = vmatprep.mubr.bf16.mxu0 %v944_v19  ;;  %2740 = vmatprep.mubr.bf16.mxu1 %v944_v19  ;;  %v932_v39 = vadd.f32 %v916_v34, %v876_v28  ;;  %v940_v41 = vadd.f32 %v924_v37, %v884_v29  ;;  %v3688_v3 = vld [vmem:[%s4570_s23 + $0x30c] ss:$16 sps:$4 sm:$0xff]   ;;  %v3683_v4 = vld [vmem:[%s4570_s23 + $0x300] ss:$16 sps:$4 sm:$0xff]   ;;  %v3686_v5 = vld [vmem:[%s4570_s23 + $0x308] ss:$16 sps:$4 sm:$0xff]  }
 0x130   : > { %2538 = vmatprep.subr.bf16.mxu0 %v3643_v13  ;;  %2710 = vmatprep.subr.bf16.mxu1 %v3646_v14  ;;  %v849_v6 = vld [vmem:[%s5170_s0 + $0x30] sm:$0xff]  ;;  %v3694_v9 = vld [vmem:[%s4570_s23 + $0x32c] ss:$16 sps:$4 sm:$0xff]   ;;  %v3692_v13 = vld [vmem:[%s4570_s23 + $0x328] ss:$16 sps:$4 sm:$0xff]  }
 0x131   : > { %v4774_v43 = vpack.c.bf16 %v940_v41, %v932_v39  ;;  %v857_v7 = vld [vmem:[%s5170_s0 + $0x70] sm:$0xff]  ;;  %v875_v10 = vmul.f32 %v4664_v24, %v849_v6  ;;  %v2842_v18 = vld [vmem:[%s4810_s11] sm:$0xff]  ;;  %v2843_v29 = vld [vmem:[%s4810_s11 + $0x8] sm:$0xff] }
 0x132   : > { %2539 = vmatpush1.bf16.msra.mxu0 %v3641_v30  ;;  %2711 = vmatpush1.bf16.msra.mxu1 %v3644_v31  ;;  %v3691_v8 = vld [vmem:[%s4570_s23 + $0x324] ss:$16 sps:$4 sm:$0xff]   ;;  %v883_v11 = vmul.f32 %v4712_v48, %v857_v7  ;;  %v3689_v12 = vld [vmem:[%s4570_s23 + $0x320] ss:$16 sps:$4 sm:$0xff]   ;;  %v2860_v22 = vmul.f32 %v2842_v18, %v4664_v24  ;;  %v4845_v30 = vld [vmem:[%s4815_s14 + $0x8] sm:$0xff] }
 0x133   : > { %2540 = vmatprep.subr.bf16.mxu0 %v3649_v35  ;;  %2712 = vmatprep.subr.bf16.mxu1 %v3652_v36  ;;  %v891_v14 = vld [vmem:[%s5171_s1 + $0x30] sm:$0xff]  ;;  %v4833_v19 = vld [vmem:[%s4815_s14] sm:$0xff]  ;;  %v3700_v32 = vld [vmem:[%s4570_s23 + $0x34c] ss:$16 sps:$4 sm:$0xff]   ;;  %v2869_v41 = vmul.f32 %v4845_v30, %v4662_v23 }
 0x134   : > { %v899_v15 = vld [vmem:[%s5171_s1 + $0x70] sm:$0xff]  ;;  %v915_v16 = vmul.f32 %v4662_v23, %v891_v14  ;;  %v2868_v25 = vmul.f32 %v4833_v19, %v4662_v23  ;;  %v3698_v37 = vld [vmem:[%s4570_s23 + $0x348] ss:$16 sps:$4 sm:$0xff]   ;;  %v3718_v14 = vld [vmem:[%s4570_s23 + $0x3ac] ss:$16 sps:$4 sm:$0xff]  }
 0x135   : > { %v923_v17 = vmul.f32 %v4710_v47, %v899_v15  ;;  %v2844_v21 = vld [vmem:[%s4810_s11 + $0x10] sm:$0xff]  ;;  %v3704_v6 = vld [vmem:[%s4570_s23 + $0x368] ss:$16 sps:$4 sm:$0xff]   ;;  %v3724_v18 = vld [vmem:[%s4570_s23 + $0x3cc] ss:$16 sps:$4 sm:$0xff]  }
 0x136   : > { %2541 = vmatpush1.bf16.msra.mxu0 %v3647_v40  ;;  %2713 = vmatpush1.bf16.msra.mxu1 %v3650_v42  ;;  %v4840_v26 = vld [vmem:[%s4815_s14 + $0x10] sm:$0xff]  ;;  %v2862_v28 = vmul.f32 %v2844_v21, %v4664_v24  ;;  %v931_v33 = vadd.f32 %v915_v16, %v875_v10  ;;  %v4853_v39 = vadd.f32 %v2868_v25, %v2860_v22  ;;  %v2845_v42 = vld [vmem:[%s4810_s11 + $0x18] sm:$0xff] }
 0x137   : > { %2542 = vmatprep.subr.bf16.mxu0 %v3655_v44  ;;  %2714 = vmatprep.subr.bf16.mxu1 %v3658_v45  ;;  %v3697_v31 = vld [vmem:[%s4570_s23 + $0x344] ss:$16 sps:$4 sm:$0xff]   ;;  %v939_v34 = vadd.f32 %v923_v17, %v883_v11  ;;  %v2870_v35 = vmul.f32 %v4840_v26, %v4662_v23  ;;  %v3695_v36 = vld [vmem:[%s4570_s23 + $0x340] ss:$16 sps:$4 sm:$0xff]   ;;  %v2861_v40 = vmul.f32 %v2843_v29, %v4664_v24  ;;  %v4860_v44 = vld [vmem:[%s4815_s14 + $0x18] sm:$0xff] }
 0x138   : > { %v3712_v10 = vld [vmem:[%s4570_s23 + $0x38c] ss:$16 sps:$4 sm:$0xff]   ;;  %v3713_v15 = vld [vmem:[%s4570_s23 + $0x3a0] ss:$16 sps:$4 sm:$0xff]   ;;  %v3716_v16 = vld [vmem:[%s4570_s23 + $0x3a8] ss:$16 sps:$4 sm:$0xff]  }
 0x139   : > { %v4862_v45 = vpack.c.bf16 %v939_v34, %v931_v33  ;;  %v3721_v17 = vld [vmem:[%s4570_s23 + $0x3c4] ss:$16 sps:$4 sm:$0xff]   ;;  %v3719_v21 = vld [vmem:[%s4570_s23 + $0x3c0] ss:$16 sps:$4 sm:$0xff]   ;;  %v3722_v22 = vld [vmem:[%s4570_s23 + $0x3c8] ss:$16 sps:$4 sm:$0xff]  }
 0x13a   : > { %2543 = vmatpush1.bf16.msra.mxu0 %v3653_v46  ;;  %2715 = vmatpush1.bf16.msra.mxu1 %v3656_v49  ;;  %v4864_v46 = vadd.f32 %v2870_v35, %v2862_v28  ;;  %v2863_v49 = vmul.f32 %v2845_v42, %v4664_v24  ;;  %v3706_v24 = vld [vmem:[%s4570_s23 + $0x36c] ss:$16 sps:$4 sm:$0xff]   ;;  %v3727_v25 = vld [vmem:[%s4570_s23 + $0x3e4] ss:$16 sps:$4 sm:$0xff]   ;;  %v3725_v29 = vld [vmem:[%s4570_s23 + $0x3e0] ss:$16 sps:$4 sm:$0xff]  }
 0x13b   : > { %2544 = vmatprep.subr.bf16.mxu0 %v3661_v50  ;;  %2716 = vmatprep.subr.bf16.mxu1 %v3664_v51  ;;  %v2871_v50 = vmul.f32 %v4860_v44, %v4662_v23  ;;  %v2846_v51 = vld [vmem:[%s4810_s11 + $0x40] sm:$0xff]  ;;  %v3730_v28 = vld [vmem:[%s4570_s23 + $0x3ec] ss:$16 sps:$4 sm:$0xff]   ;;  %v3734_v35 = vld [vmem:[%s4570_s23 + $0x408] ss:$16 sps:$4 sm:$0xff]  }
 0x13c   : > { %v3703_v23 = vld [vmem:[%s4570_s23 + $0x364] ss:$16 sps:$4 sm:$0xff]   ;;  %v3736_v33 = vld [vmem:[%s4570_s23 + $0x40c] ss:$16 sps:$4 sm:$0xff]   ;;  %v3731_v34 = vld [vmem:[%s4570_s23 + $0x400] ss:$16 sps:$4 sm:$0xff]  }
 0x13d   : > { %v3745_v42 = vld [vmem:[%s4570_s23 + $0x444] ss:$16 sps:$4 sm:$0xff]  }
 0x13e   : > { %2545 = vmatpush1.bf16.msra.mxu0 %v3659_v52  ;;  %2717 = vmatpush1.bf16.msra.mxu1 %v3662_v53  ;;  %v4871_v52 = vld [vmem:[%s4815_s14 + $0x40] sm:$0xff]  ;;  %v2848_v53 = vld [vmem:[%s4810_s11 + $0x50] sm:$0xff] }
 0x13f   : > { %2546 = vmatprep.subr.bf16.mxu0 %v3667_v54  ;;  %2718 = vmatprep.subr.bf16.mxu1 %v3670_v55  ;;  %v4874_v54 = vadd.f32 %v2869_v41, %v2861_v40  ;;  %v2864_v55 = vmul.f32 %v2846_v51, %v4712_v48  ;;  %v3737_v40 = vld [vmem:[%s4570_s23 + $0x420] ss:$16 sps:$4 sm:$0xff]   ;;  %v3740_v41 = vld [vmem:[%s4570_s23 + $0x428] ss:$16 sps:$4 sm:$0xff]  }
 0x140   : > { %v3923_v51 = vld [vmem:[%s5174_s4] sm:$0xff] }
 0x142   : > { %2547 = vmatpush1.bf16.msra.mxu0 %v3665_v56  ;;  %2719 = vmatpush1.bf16.msra.mxu1 %v3668_v57  ;;  %v4878_v56 = vld [vmem:[%s4815_s14 + $0x50] sm:$0xff]  ;;  %v2847_v57 = vld [vmem:[%s4810_s11 + $0x48] sm:$0xff] }
 0x143   : > { %2548 = vmatprep.subr.bf16.mxu0 %v3673_v58  ;;  %2720 = vmatprep.subr.bf16.mxu1 %v3676_v59  ;;  %v4882_v58 = vld [vmem:[%s4815_s14 + $0x48] sm:$0xff]  ;;  %v4886_v59 = vadd.f32 %v2871_v50, %v2863_v49  ;;  %v3952_v50 = vmov 3  }
 0x144   : > { %v3748_v49 = vld [vmem:[%s4570_s23 + $0x44c] ss:$16 sps:$4 sm:$0xff]   ;;  %3535 = vset.pattern.permute.xlu1 %v3952_v50  ;;  %3536 = vset.pattern.permute.xlu0 %v3952_v50  ;;  %v3806_v50 = vld [vmem:[%s4570_s23 + $0x588] ss:$16 sps:$4 sm:$0xff]  }
 0x145   : > { %2917 = vperm.xlu1 %3535, %v3923_v51  }
 0x146   : > { %2549 = vmatpush1.bf16.msra.mxu0 %v3671_v60  ;;  %2721 = vmatpush1.bf16.msra.mxu1 %v3674_v61  ;;  %v2872_v60 = vmul.f32 %v4871_v52, %v4710_v47  ;;  %v2866_v61 = vmul.f32 %v2848_v53, %v4712_v48  ;;  %v3751_v53 = vld [vmem:[%s4570_s23 + $0x464] ss:$16 sps:$4 sm:$0xff]  }
 0x147   : > { %2550 = vmatprep.subr.bf16.mxu0 %v3679_v62  ;;  %2722 = vmatprep.subr.bf16.mxu1 %v3682_v63  ;;  %v2874_v62 = vmul.f32 %v4878_v56, %v4710_v47  ;;  %v2865_v63 = vmul.f32 %v2847_v57, %v4712_v48  ;;  %v3924_v57 = vld [vmem:[%s5174_s4 + $0x8] sm:$0xff] }
 0x148   : > { %2921 = vperm.xlu0 %3536, %v3924_v57  }
 0x149   : > { %v4905_v7 = vadd.f32 %v2874_v62, %v2866_v61  ;;  %v3757_v61 = vld [vmem:[%s4570_s23 + $0x484] ss:$16 sps:$4 sm:$0xff]   ;;  %v3760_v62 = vld [vmem:[%s4570_s23 + $0x48c] ss:$16 sps:$4 sm:$0xff]  }
 0x14a   : > { %2551 = vmatpush1.bf16.msra.mxu0 %v3677_v0  ;;  %2723 = vmatpush1.bf16.msra.mxu1 %v3680_v1  ;;  %v2849_v0 = vld [vmem:[%s4810_s11 + $0x58] sm:$0xff] }
 0x14b   : > { %2552 = vmatprep.subr.bf16.mxu0 %v3685_v2  ;;  %2724 = vmatprep.subr.bf16.mxu1 %v3688_v3  ;;  %v4896_v1 = vld [vmem:[%s4815_s14 + $0x58] sm:$0xff]  ;;  %v4898_v2 = vadd.f32 %v2872_v60, %v2864_v55  ;;  %v2873_v3 = vmul.f32 %v4882_v58, %v4710_v47 }
 0x14c   : > { %v3754_v55 = vld [vmem:[%s4570_s23 + $0x46c] ss:$16 sps:$4 sm:$0xff]   ;;  %v3752_v60 = vld [vmem:[%s4570_s23 + $0x468] ss:$16 sps:$4 sm:$0xff]  }
 0x14d   : > { %v4911_v11 = vadd.f32 %v2873_v3, %v2865_v63  ;;  %v3755_v63 = vld [vmem:[%s4570_s23 + $0x480] ss:$16 sps:$4 sm:$0xff]   ;;  %v3763_v3 = vld [vmem:[%s4570_s23 + $0x4a4] ss:$16 sps:$4 sm:$0xff]  }
 0x14e   : > { %2553 = vmatpush1.bf16.msra.mxu0 %v3683_v4  ;;  %2725 = vmatpush1.bf16.msra.mxu1 %v3686_v5  ;;  %v2867_v4 = vmul.f32 %v2849_v0, %v4712_v48  ;;  %v3701_v5 = vld [vmem:[%s4570_s23 + $0x360] ss:$16 sps:$4 sm:$0xff]   ;;  %v3758_v0 = vld [vmem:[%s4570_s23 + $0x488] ss:$16 sps:$4 sm:$0xff]  }
 0x14f   : > { %2554 = vmatprep.subr.bf16.mxu0 %v3691_v8  ;;  %2726 = vmatprep.subr.bf16.mxu1 %v3694_v9  ;;  %v2875_v8 = vmul.f32 %v4896_v1, %v4710_v47  ;;  %v3709_v9 = vld [vmem:[%s4570_s23 + $0x384] ss:$16 sps:$4 sm:$0xff]  }
 0x150   : > { %v3715_v47 = vld [vmem:[%s4570_s23 + $0x3a4] ss:$16 sps:$4 sm:$0xff]  }
 0x151   : > { %v4913_v48 = vadd.f32 %v2875_v8, %v2867_v4  ;;  %v3766_v4 = vld [vmem:[%s4570_s23 + $0x4ac] ss:$16 sps:$4 sm:$0xff]   ;;  %v3769_v8 = vld [vmem:[%s4570_s23 + $0x4c4] ss:$16 sps:$4 sm:$0xff]  }
 0x152   : > { %2555 = vmatpush1.bf16.msra.mxu0 %v3689_v12  ;;  %2727 = vmatpush1.bf16.msra.mxu1 %v3692_v13  ;;  %v3707_v12 = vld [vmem:[%s4570_s23 + $0x380] ss:$16 sps:$4 sm:$0xff]   ;;  %v3710_v13 = vld [vmem:[%s4570_s23 + $0x388] ss:$16 sps:$4 sm:$0xff]  }
 0x153   : > { %2556 = vmatprep.subr.bf16.mxu0 %v3697_v31  ;;  %2728 = vmatprep.subr.bf16.mxu1 %v3700_v32  ;;  %v3728_v31 = vld [vmem:[%s4570_s23 + $0x3e8] ss:$16 sps:$4 sm:$0xff]   ;;  %v3733_v32 = vld [vmem:[%s4570_s23 + $0x404] ss:$16 sps:$4 sm:$0xff]  }
 0x156   : > { %2557 = vmatpush1.bf16.msra.mxu0 %v3695_v36  ;;  %2729 = vmatpush1.bf16.msra.mxu1 %v3698_v37  ;;  %v3739_v36 = vld [vmem:[%s4570_s23 + $0x424] ss:$16 sps:$4 sm:$0xff]   ;;  %v3742_v37 = vld [vmem:[%s4570_s23 + $0x42c] ss:$16 sps:$4 sm:$0xff]  }
 0x157   : > { %2558 = vmatprep.subr.bf16.mxu0 %v3703_v23  ;;  %2730 = vmatprep.subr.bf16.mxu1 %v3706_v24  ;;  %v3749_v23 = vld [vmem:[%s4570_s23 + $0x460] ss:$16 sps:$4 sm:$0xff]   ;;  %v3953_v24 = vmov 4  }
 0x158   : > { %3537 = vset.pattern.permute.xlu1 %v3953_v24  ;;  %3538 = vset.pattern.permute.xlu0 %v3953_v24  ;;  %v3818_v24 = vld [vmem:[%s4570_s23 + $0x5c8] ss:$16 sps:$4 sm:$0xff]  }
 0x159   : > { %2957 = vperm.xlu1 %3537, %v3923_v51   ;;  %v3814_v51 = vld [vmem:[%s4570_s23 + $0x5ac] ss:$16 sps:$4 sm:$0xff]  }
 0x15a   : > { %2559 = vmatpush1.bf16.msra.mxu0 %v3701_v5  ;;  %2731 = vmatpush1.bf16.msra.mxu1 %v3704_v6  ;;  %v3761_v5 = vld [vmem:[%s4570_s23 + $0x4a0] ss:$16 sps:$4 sm:$0xff]   ;;  %v3764_v6 = vld [vmem:[%s4570_s23 + $0x4a8] ss:$16 sps:$4 sm:$0xff]  }
 0x15b   : > { %2560 = vmatprep.subr.bf16.mxu0 %v3709_v9  ;;  %2732 = vmatprep.subr.bf16.mxu1 %v3712_v10  ;;  %v3772_v9 = vld [vmem:[%s4570_s23 + $0x4cc] ss:$16 sps:$4 sm:$0xff]   ;;  %v3767_v10 = vld [vmem:[%s4570_s23 + $0x4c0] ss:$16 sps:$4 sm:$0xff]  }
 0x15d   : > { %2961 = vperm.xlu1 %3537, %v3924_v57   ;;  %v3820_v57 = vld [vmem:[%s4570_s23 + $0x5cc] ss:$16 sps:$4 sm:$0xff]  }
 0x15e   : > { %2561 = vmatpush1.bf16.msra.mxu0 %v3707_v12  ;;  %2733 = vmatpush1.bf16.msra.mxu1 %v3710_v13  ;;  %v3770_v12 = vld [vmem:[%s4570_s23 + $0x4c8] ss:$16 sps:$4 sm:$0xff]   ;;  %v3775_v13 = vld [vmem:[%s4570_s23 + $0x4e4] ss:$16 sps:$4 sm:$0xff]  }
 0x15f   : > { %2562 = vmatprep.subr.bf16.mxu0 %v3715_v47  ;;  %2734 = vmatprep.subr.bf16.mxu1 %v3718_v14  ;;  %v3778_v47 = vld [vmem:[%s4570_s23 + $0x4ec] ss:$16 sps:$4 sm:$0xff]   ;;  %v3773_v14 = vld [vmem:[%s4570_s23 + $0x4e0] ss:$16 sps:$4 sm:$0xff]  }
 0x162   : > { %2563 = vmatpush1.bf16.msra.mxu0 %v3713_v15  ;;  %2735 = vmatpush1.bf16.msra.mxu1 %v3716_v16  ;;  %v3776_v15 = vld [vmem:[%s4570_s23 + $0x4e8] ss:$16 sps:$4 sm:$0xff]   ;;  %v3781_v16 = vld [vmem:[%s4570_s23 + $0x504] ss:$16 sps:$4 sm:$0xff]  }
 0x163   : > { %2564 = vmatprep.subr.bf16.mxu0 %v3721_v17  ;;  %2736 = vmatprep.subr.bf16.mxu1 %v3724_v18  ;;  %v3784_v17 = vld [vmem:[%s4570_s23 + $0x50c] ss:$16 sps:$4 sm:$0xff]   ;;  %v3779_v18 = vld [vmem:[%s4570_s23 + $0x500] ss:$16 sps:$4 sm:$0xff]  }
 0x166   : > { %2565 = vmatpush1.bf16.msra.mxu0 %v3719_v21  ;;  %2737 = vmatpush1.bf16.msra.mxu1 %v3722_v22  ;;  %v3782_v21 = vld [vmem:[%s4570_s23 + $0x508] ss:$16 sps:$4 sm:$0xff]   ;;  %v3787_v22 = vld [vmem:[%s4570_s23 + $0x524] ss:$16 sps:$4 sm:$0xff]  }
 0x167   : > { %2566 = vmatprep.subr.bf16.mxu0 %v3727_v25  ;;  %2738 = vmatprep.subr.bf16.mxu1 %v3730_v28  ;;  %v3790_v25 = vld [vmem:[%s4570_s23 + $0x52c] ss:$16 sps:$4 sm:$0xff]   ;;  %v3785_v28 = vld [vmem:[%s4570_s23 + $0x520] ss:$16 sps:$4 sm:$0xff]  }
 0x16a   : > { %2567 = vmatpush1.bf16.msra.mxu0 %v3725_v29  ;;  %2739 = vmatpush1.bf16.msra.mxu1 %v3728_v31  ;;  %v3788_v29 = vld [vmem:[%s4570_s23 + $0x528] ss:$16 sps:$4 sm:$0xff]   ;;  %v3793_v31 = vld [vmem:[%s4570_s23 + $0x544] ss:$16 sps:$4 sm:$0xff]  }
 0x16b   : > { %2579 = vmatprep.subr.bf16.mxu0 %v3733_v32  ;;  %2751 = vmatprep.subr.bf16.mxu1 %v3736_v33  ;;  %v3796_v32 = vld [vmem:[%s4570_s23 + $0x54c] ss:$16 sps:$4 sm:$0xff]   ;;  %v3791_v33 = vld [vmem:[%s4570_s23 + $0x540] ss:$16 sps:$4 sm:$0xff]  }
 0x16d   : > { %2569 = vmatmul.mubr.bf16.vlgmr.msra.gmra.mrb[0].mxu0 %v4750_v20  ;;  %2741 = vmatmul.mubr.bf16.vlgmr.msra.gmra.mrb[0].mxu1 %v4750_v20  ;;  %v3743_v20 = vld [vmem:[%s4570_s23 + $0x440] ss:$16 sps:$4 sm:$0xff]  }
 0x16e   : > { %2580 = vmatpush1.bf16.msra.mxu0 %v3731_v34  ;;  %2611 = vmatprep.mubr.bf16.mxu0 %v4760_v27  ;;  %v3794_v34 = vld [vmem:[%s4570_s23 + $0x548] ss:$16 sps:$4 sm:$0xff]  }
 0x16f   : > { %2752 = vmatpush1.bf16.msra.mxu1 %v3734_v35  ;;  %2783 = vmatprep.mubr.bf16.mxu1 %v4760_v27  ;;  %v3746_v27 = vld [vmem:[%s4570_s23 + $0x448] ss:$16 sps:$4 sm:$0xff]   ;;  %v3799_v35 = vld [vmem:[%s4570_s23 + $0x564] ss:$16 sps:$4 sm:$0xff]  }
 0x170   : > { %2581 = vmatprep.subr.bf16.mxu0 %v3739_v36  ;;  %2753 = vmatprep.subr.bf16.mxu1 %v3742_v37  ;;  %v3802_v36 = vld [vmem:[%s4570_s23 + $0x56c] ss:$16 sps:$4 sm:$0xff]   ;;  %v3797_v37 = vld [vmem:[%s4570_s23 + $0x560] ss:$16 sps:$4 sm:$0xff]  }
 0x172   : > { %2582 = vmatpush1.bf16.msra.mxu0 %v3737_v40  ;;  %v3800_v40 = vld [vmem:[%s4570_s23 + $0x568] ss:$16 sps:$4 sm:$0xff]  }
 0x173   : > { %2754 = vmatpush1.bf16.msra.mxu1 %v3740_v41  ;;  %2583 = vmatprep.subr.bf16.mxu0 %v3745_v42  ;;  %v3805_v41 = vld [vmem:[%s4570_s23 + $0x584] ss:$16 sps:$4 sm:$0xff]   ;;  %v3808_v42 = vld [vmem:[%s4570_s23 + $0x58c] ss:$16 sps:$4 sm:$0xff]  }
 0x174   : > { %2755 = vmatprep.subr.bf16.mxu1 %v3748_v49  ;;  %v3803_v49 = vld [vmem:[%s4570_s23 + $0x580] ss:$16 sps:$4 sm:$0xff]  }
 0x176   : > { %2584 = vmatpush1.bf16.msra.mxu0 %v3743_v20  ;;  %v3811_v20 = vld [vmem:[%s4570_s23 + $0x5a4] ss:$16 sps:$4 sm:$0xff]  }
 0x177   : > { %2756 = vmatpush1.bf16.msra.mxu1 %v3746_v27  ;;  %2585 = vmatprep.subr.bf16.mxu0 %v3751_v53  ;;  %v3809_v27 = vld [vmem:[%s4570_s23 + $0x5a0] ss:$16 sps:$4 sm:$0xff]   ;;  %v3812_v53 = vld [vmem:[%s4570_s23 + $0x5a8] ss:$16 sps:$4 sm:$0xff]  }
 0x178   : > { %2757 = vmatprep.subr.bf16.mxu1 %v3754_v55  ;;  %v3817_v55 = vld [vmem:[%s4570_s23 + $0x5c4] ss:$16 sps:$4 sm:$0xff]  }
 0x17a   : > { %2586 = vmatpush1.bf16.msra.mxu0 %v3749_v23  ;;  %v3815_v23 = vld [vmem:[%s4570_s23 + $0x5c0] ss:$16 sps:$4 sm:$0xff]  }
 0x17b   : > { %2758 = vmatpush1.bf16.msra.mxu1 %v3752_v60  ;;  %2587 = vmatprep.subr.bf16.mxu0 %v3757_v61  ;;  %v3823_v60 = vld [vmem:[%s4570_s23 + $0x5e4] ss:$16 sps:$4 sm:$0xff]   ;;  %v3826_v61 = vld [vmem:[%s4570_s23 + $0x5ec] ss:$16 sps:$4 sm:$0xff]  }
 0x17c   : > { %2759 = vmatprep.subr.bf16.mxu1 %v3760_v62  ;;  %v3821_v62 = vld [vmem:[%s4570_s23 + $0x5e0] ss:$16 sps:$4 sm:$0xff]  }
 0x17e   : > { %2588 = vmatpush1.bf16.msra.mxu0 %v3755_v63  ;;  %v3824_v63 = vld [vmem:[%s4570_s23 + $0x5e8] ss:$16 sps:$4 sm:$0xff]  }
 0x17f   : > { %2760 = vmatpush1.bf16.msra.mxu1 %v3758_v0  ;;  %2589 = vmatprep.subr.bf16.mxu0 %v3763_v3  ;;  %v3829_v0 = vld [vmem:[%s4570_s23 + $0x604] ss:$16 sps:$4 sm:$0xff]   ;;  %v3832_v3 = vld [vmem:[%s4570_s23 + $0x60c] ss:$16 sps:$4 sm:$0xff]  }
 0x180   : > { %2761 = vmatprep.subr.bf16.mxu1 %v3766_v4  ;;  %v3827_v4 = vld [vmem:[%s4570_s23 + $0x600] ss:$16 sps:$4 sm:$0xff]  }
 0x182   : > { %2590 = vmatpush1.bf16.msra.mxu0 %v3761_v5  ;;  %v3830_v5 = vld [vmem:[%s4570_s23 + $0x608] ss:$16 sps:$4 sm:$0xff]  }
 0x183   : > { %2762 = vmatpush1.bf16.msra.mxu1 %v3764_v6  ;;  %2591 = vmatprep.subr.bf16.mxu0 %v3769_v8  ;;  %v3835_v6 = vld [vmem:[%s4570_s23 + $0x624] ss:$16 sps:$4 sm:$0xff]   ;;  %v3838_v8 = vld [vmem:[%s4570_s23 + $0x62c] ss:$16 sps:$4 sm:$0xff]  }
 0x184   : > { %2763 = vmatprep.subr.bf16.mxu1 %v3772_v9  ;;  %v3833_v9 = vld [vmem:[%s4570_s23 + $0x620] ss:$16 sps:$4 sm:$0xff]  }
 0x186   : > { %2592 = vmatpush1.bf16.msra.mxu0 %v3767_v10  ;;  %v3836_v10 = vld [vmem:[%s4570_s23 + $0x628] ss:$16 sps:$4 sm:$0xff]  }
 0x187   : > { %2764 = vmatpush1.bf16.msra.mxu1 %v3770_v12  ;;  %2593 = vmatprep.subr.bf16.mxu0 %v3775_v13  ;;  %v3841_v12 = vld [vmem:[%s4570_s23 + $0x644] ss:$16 sps:$4 sm:$0xff]   ;;  %v3844_v13 = vld [vmem:[%s4570_s23 + $0x64c] ss:$16 sps:$4 sm:$0xff]  }
 0x188   : > { %2765 = vmatprep.subr.bf16.mxu1 %v3778_v47  ;;  %v3842_v47 = vld [vmem:[%s4570_s23 + $0x648] ss:$16 sps:$4 sm:$0xff]  }
 0x18a   : > { %2594 = vmatpush1.bf16.msra.mxu0 %v3773_v14  ;;  %v3847_v14 = vld [vmem:[%s4570_s23 + $0x664] ss:$16 sps:$4 sm:$0xff]  }
 0x18b   : > { %2766 = vmatpush1.bf16.msra.mxu1 %v3776_v15  ;;  %2595 = vmatprep.subr.bf16.mxu0 %v3781_v16  ;;  %v3850_v15 = vld [vmem:[%s4570_s23 + $0x66c] ss:$16 sps:$4 sm:$0xff]   ;;  %v3848_v16 = vld [vmem:[%s4570_s23 + $0x668] ss:$16 sps:$4 sm:$0xff]  }
 0x18c   : > { %2767 = vmatprep.subr.bf16.mxu1 %v3784_v17  ;;  %v3853_v17 = vld [vmem:[%s4570_s23 + $0x684] ss:$16 sps:$4 sm:$0xff]  }
 0x18e   : > { %2596 = vmatpush1.bf16.msra.mxu0 %v3779_v18  ;;  %v3856_v18 = vld [vmem:[%s4570_s23 + $0x68c] ss:$16 sps:$4 sm:$0xff]  }
 0x18f   : > { %2768 = vmatpush1.bf16.msra.mxu1 %v3782_v21  ;;  %2597 = vmatprep.subr.bf16.mxu0 %v3787_v22  ;;  %v3851_v21 = vld [vmem:[%s4570_s23 + $0x680] ss:$16 sps:$4 sm:$0xff]   ;;  %v3854_v22 = vld [vmem:[%s4570_s23 + $0x688] ss:$16 sps:$4 sm:$0xff]  }
 0x190   : > { %2769 = vmatprep.subr.bf16.mxu1 %v3790_v25  ;;  %v3859_v25 = vld [vmem:[%s4570_s23 + $0x6a4] ss:$16 sps:$4 sm:$0xff]  }
 0x192   : > { %2598 = vmatpush1.bf16.msra.mxu0 %v3785_v28  ;;  %v3862_v28 = vld [vmem:[%s4570_s23 + $0x6ac] ss:$16 sps:$4 sm:$0xff]  }
 0x193   : > { %2770 = vmatpush1.bf16.msra.mxu1 %v3788_v29  ;;  %2599 = vmatprep.subr.bf16.mxu0 %v3793_v31  ;;  %v3857_v29 = vld [vmem:[%s4570_s23 + $0x6a0] ss:$16 sps:$4 sm:$0xff]   ;;  %v3860_v31 = vld [vmem:[%s4570_s23 + $0x6a8] ss:$16 sps:$4 sm:$0xff]  }
 0x194   : > { %2771 = vmatprep.subr.bf16.mxu1 %v3796_v32  ;;  %v3865_v32 = vld [vmem:[%s4570_s23 + $0x6c4] ss:$16 sps:$4 sm:$0xff]  }
 0x196   : > { %2600 = vmatpush1.bf16.msra.mxu0 %v3791_v33  ;;  %v3868_v33 = vld [vmem:[%s4570_s23 + $0x6cc] ss:$16 sps:$4 sm:$0xff]  }
 0x197   : > { %2772 = vmatpush1.bf16.msra.mxu1 %v3794_v34  ;;  %2601 = vmatprep.subr.bf16.mxu0 %v3799_v35  ;;  %v3863_v34 = vld [vmem:[%s4570_s23 + $0x6c0] ss:$16 sps:$4 sm:$0xff]   ;;  %v3866_v35 = vld [vmem:[%s4570_s23 + $0x6c8] ss:$16 sps:$4 sm:$0xff]  }
 0x198   : > { %2773 = vmatprep.subr.bf16.mxu1 %v3802_v36  ;;  %v3871_v36 = vld [vmem:[%s4570_s23 + $0x6e4] ss:$16 sps:$4 sm:$0xff]  }
 0x19a   : > { %2602 = vmatpush1.bf16.msra.mxu0 %v3797_v37  ;;  %v3874_v37 = vld [vmem:[%s4570_s23 + $0x6ec] ss:$16 sps:$4 sm:$0xff]  }
 0x19b   : > { %2774 = vmatpush1.bf16.msra.mxu1 %v3800_v40  ;;  %2603 = vmatprep.subr.bf16.mxu0 %v3805_v41  ;;  %v3869_v40 = vld [vmem:[%s4570_s23 + $0x6e0] ss:$16 sps:$4 sm:$0xff]   ;;  %v3872_v41 = vld [vmem:[%s4570_s23 + $0x6e8] ss:$16 sps:$4 sm:$0xff]  }
 0x19c   : > { %2775 = vmatprep.subr.bf16.mxu1 %v3808_v42  ;;  %v3877_v42 = vld [vmem:[%s4570_s23 + $0x704] ss:$16 sps:$4 sm:$0xff]  }
 0x19e   : > { %2604 = vmatpush1.bf16.msra.mxu0 %v3803_v49  ;;  %v3880_v49 = vld [vmem:[%s4570_s23 + $0x70c] ss:$16 sps:$4 sm:$0xff]  }
 0x19f   : > { %2776 = vmatpush1.bf16.msra.mxu1 %v3806_v50  ;;  %2605 = vmatprep.subr.bf16.mxu0 %v3811_v20  ;;  %v3875_v50 = vld [vmem:[%s4570_s23 + $0x700] ss:$16 sps:$4 sm:$0xff]   ;;  %v3878_v20 = vld [vmem:[%s4570_s23 + $0x708] ss:$16 sps:$4 sm:$0xff]  }
 0x1a0   : > { %2777 = vmatprep.subr.bf16.mxu1 %v3814_v51  ;;  %v3883_v51 = vld [vmem:[%s4570_s23 + $0x724] ss:$16 sps:$4 sm:$0xff]  }
 0x1a2   : > { %2606 = vmatpush1.bf16.msra.mxu0 %v3809_v27  ;;  %v3886_v27 = vld [vmem:[%s4570_s23 + $0x72c] ss:$16 sps:$4 sm:$0xff]  }
 0x1a3   : > { %2778 = vmatpush1.bf16.msra.mxu1 %v3812_v53  ;;  %2607 = vmatprep.subr.bf16.mxu0 %v3817_v55  ;;  %v3881_v53 = vld [vmem:[%s4570_s23 + $0x720] ss:$16 sps:$4 sm:$0xff]   ;;  %v3884_v55 = vld [vmem:[%s4570_s23 + $0x728] ss:$16 sps:$4 sm:$0xff]  }
 0x1a4   : > { %2779 = vmatprep.subr.bf16.mxu1 %v3820_v57  ;;  %v3889_v57 = vld [vmem:[%s4570_s23 + $0x744] ss:$16 sps:$4 sm:$0xff]  }
 0x1a6   : > { %2608 = vmatpush1.bf16.msra.mxu0 %v3815_v23  ;;  %v3892_v23 = vld [vmem:[%s4570_s23 + $0x74c] ss:$16 sps:$4 sm:$0xff]  }
 0x1a7   : > { %2780 = vmatpush1.bf16.msra.mxu1 %v3818_v24  ;;  %2609 = vmatprep.subr.bf16.mxu0 %v3823_v60  ;;  %v3887_v24 = vld [vmem:[%s4570_s23 + $0x740] ss:$16 sps:$4 sm:$0xff]   ;;  %v3890_v60 = vld [vmem:[%s4570_s23 + $0x748] ss:$16 sps:$4 sm:$0xff]  }
 0x1a8   : > { %2781 = vmatprep.subr.bf16.mxu1 %v3826_v61  ;;  %v3895_v61 = vld [vmem:[%s4570_s23 + $0x764] ss:$16 sps:$4 sm:$0xff]  }
 0x1aa   : > { %2610 = vmatpush1.bf16.msra.mxu0 %v3821_v62  ;;  %v3898_v62 = vld [vmem:[%s4570_s23 + $0x76c] ss:$16 sps:$4 sm:$0xff]  }
 0x1ab   : > { %2782 = vmatpush1.bf16.msra.mxu1 %v3824_v63  ;;  %2622 = vmatprep.subr.bf16.mxu0 %v3829_v0  ;;  %v3893_v63 = vld [vmem:[%s4570_s23 + $0x760] ss:$16 sps:$4 sm:$0xff]   ;;  %v3896_v0 = vld [vmem:[%s4570_s23 + $0x768] ss:$16 sps:$4 sm:$0xff]  }
 0x1ac   : > { %2794 = vmatprep.subr.bf16.mxu1 %v3832_v3  ;;  %v3901_v3 = vld [vmem:[%s4570_s23 + $0x784] ss:$16 sps:$4 sm:$0xff]  }
 0x1ad   : > { %2612 = vmatmul.mubr.bf16.vlgmr.msra.gmra.mrb[0].mxu0 %v4770_v38 }
 0x1ae   : > { %2784 = vmatmul.mubr.bf16.vlgmr.msra.gmra.mrb[0].mxu1 %v4770_v38  ;;  %2623 = vmatpush1.bf16.msra.mxu0 %v3827_v4  ;;  %v3839_v38 = vld [vmem:[%s4570_s23 + $0x640] ss:$16 sps:$4 sm:$0xff]   ;;  %v3904_v4 = vld [vmem:[%s4570_s23 + $0x78c] ss:$16 sps:$4 sm:$0xff]  }
 0x1af   : > { %2654 = vmatprep.mubr.bf16.mxu0 %v4774_v43  ;;  %2795 = vmatpush1.bf16.msra.mxu1 %v3830_v5  ;;  %v3899_v5 = vld [vmem:[%s4570_s23 + $0x780] ss:$16 sps:$4 sm:$0xff]  }
 0x1b0   : > { %2826 = vmatprep.mubr.bf16.mxu1 %v4774_v43  ;;  %2624 = vmatprep.subr.bf16.mxu0 %v3835_v6  ;;  %v3845_v43 = vld [vmem:[%s4570_s23 + $0x660] ss:$16 sps:$4 sm:$0xff]   ;;  %v3902_v6 = vld [vmem:[%s4570_s23 + $0x788] ss:$16 sps:$4 sm:$0xff]  }
 0x1b1   : > { %2796 = vmatprep.subr.bf16.mxu1 %v3838_v8  ;;  %v3907_v8 = vld [vmem:[%s4570_s23 + $0x7a4] ss:$16 sps:$4 sm:$0xff]  }
 0x1b2   : > { %2625 = vmatpush1.bf16.msra.mxu0 %v3833_v9  ;;  %v3910_v9 = vld [vmem:[%s4570_s23 + $0x7ac] ss:$16 sps:$4 sm:$0xff]  }
 0x1b3   : > { %2797 = vmatpush1.bf16.msra.mxu1 %v3836_v10  ;;  %2626 = vmatprep.subr.bf16.mxu0 %v3841_v12  ;;  %v3905_v10 = vld [vmem:[%s4570_s23 + $0x7a0] ss:$16 sps:$4 sm:$0xff]   ;;  %v3908_v12 = vld [vmem:[%s4570_s23 + $0x7a8] ss:$16 sps:$4 sm:$0xff]  }
 0x1b4   : > { %2798 = vmatprep.subr.bf16.mxu1 %v3844_v13  ;;  %v3913_v13 = vld [vmem:[%s4570_s23 + $0x7c4] ss:$16 sps:$4 sm:$0xff]  }
 0x1b6   : > { %2627 = vmatpush1.bf16.msra.mxu0 %v3839_v38  ;;  %v3916_v38 = vld [vmem:[%s4570_s23 + $0x7cc] ss:$16 sps:$4 sm:$0xff]  }
 0x1b7   : > { %2799 = vmatpush1.bf16.msra.mxu1 %v3842_v47  ;;  %2628 = vmatprep.subr.bf16.mxu0 %v3847_v14  ;;  %v3911_v47 = vld [vmem:[%s4570_s23 + $0x7c0] ss:$16 sps:$4 sm:$0xff]   ;;  %v3914_v14 = vld [vmem:[%s4570_s23 + $0x7c8] ss:$16 sps:$4 sm:$0xff]  }
 0x1b8   : > { %2800 = vmatprep.subr.bf16.mxu1 %v3850_v15  ;;  %v3919_v15 = vld [vmem:[%s4570_s23 + $0x7e4] ss:$16 sps:$4 sm:$0xff]  }
 0x1ba   : > { %2629 = vmatpush1.bf16.msra.mxu0 %v3845_v43  ;;  %v3922_v43 = vld [vmem:[%s4570_s23 + $0x7ec] ss:$16 sps:$4 sm:$0xff]  }
 0x1bb   : > { %2801 = vmatpush1.bf16.msra.mxu1 %v3848_v16  ;;  %2630 = vmatprep.subr.bf16.mxu0 %v3853_v17  ;;  %v3917_v16 = vld [vmem:[%s4570_s23 + $0x7e0] ss:$16 sps:$4 sm:$0xff]   ;;  %v3920_v17 = vld [vmem:[%s4570_s23 + $0x7e8] ss:$16 sps:$4 sm:$0xff]   ;;  %s3468_s23 = sshll.u32 (%p4024_p5), %s4005_s24, 5 }
 0x1bc   : > { %2802 = vmatprep.subr.bf16.mxu1 %v3856_v18  ;;  %v5077_v18 = vpop.permute.xlu1 %2905  ;;  %s3001_s11 = scalar_lea.vmem (%p4024_p5), %s5175_s5, %s3468_s23 }
 0x1be   : > { %2631 = vmatpush1.bf16.msra.mxu0 %v3851_v21  ;;  %v2902_v21 = vpop.permute.xlu0 %2901 }
 0x1bf   : > { %2803 = vmatpush1.bf16.msra.mxu1 %v3854_v22  ;;  %2632 = vmatprep.subr.bf16.mxu0 %v3859_v25  ;;  %v1205_v22 = vld [vmem:[%s5080_s8] sm:$0xff]  ;;  %v1207_v25 = vld [vmem:[%s5080_s8 + $0x10] sm:$0xff] }
 0x1c0   : > { %2804 = vmatprep.subr.bf16.mxu1 %v3862_v28  ;;  %v1206_v28 = vld [vmem:[%s5080_s8 + $0x8] sm:$0xff] }
 0x1c2   : > { %2633 = vmatpush1.bf16.msra.mxu0 %v3857_v29 }
 0x1c3   : > { %2805 = vmatpush1.bf16.msra.mxu1 %v3860_v31  ;;  %2634 = vmatprep.subr.bf16.mxu0 %v3865_v32  ;;  %v1209_v32 = vld [vmem:[%s5080_s8 + $0x20] sm:$0xff] }
 0x1c4   : > { %2806 = vmatprep.subr.bf16.mxu1 %v3868_v33  ;;  %v2918_v29 = vpop.permute.xlu1 %2917 }
 0x1c6   : > { %2635 = vmatpush1.bf16.msra.mxu0 %v3863_v34  ;;  %v2908_v34 = vmul.f32 %v2902_v21, %v4853_v39 }
 0x1c7   : > { %2807 = vmatpush1.bf16.msra.mxu1 %v3866_v35  ;;  %2636 = vmatprep.subr.bf16.mxu0 %v3871_v36  ;;  %v2910_v36 = vmul.f32 %v2902_v21, %v4864_v46 }
 0x1c8   : > { %2808 = vmatprep.subr.bf16.mxu1 %v3874_v37 }
 0x1ca   : > { %2637 = vmatpush1.bf16.msra.mxu0 %v3869_v40 }
 0x1cb   : > { %2809 = vmatpush1.bf16.msra.mxu1 %v3872_v41  ;;  %2638 = vmatprep.subr.bf16.mxu0 %v3877_v42  ;;  %v2909_v42 = vmul.f32 %v2902_v21, %v4874_v54 }
 0x1cc   : > { %2810 = vmatprep.subr.bf16.mxu1 %v3880_v49 }
 0x1ce   : > { %2639 = vmatpush1.bf16.msra.mxu0 %v3875_v50  ;;  %v2911_v50 = vmul.f32 %v2902_v21, %v4886_v59 }
 0x1cf   : > { %2811 = vmatpush1.bf16.msra.mxu1 %v3878_v20  ;;  %2640 = vmatprep.subr.bf16.mxu0 %v3883_v51 }
 0x1d0   : > { %2812 = vmatprep.subr.bf16.mxu1 %v3886_v27 }
 0x1d2   : > { %2641 = vmatpush1.bf16.msra.mxu0 %v3881_v53 }
 0x1d3   : > { %2813 = vmatpush1.bf16.msra.mxu1 %v3884_v55  ;;  %2642 = vmatprep.subr.bf16.mxu0 %v3889_v57 }
 0x1d4   : > { %2814 = vmatprep.subr.bf16.mxu1 %v3892_v23 }
 0x1d6   : > { %2643 = vmatpush1.bf16.msra.mxu0 %v3887_v24 }
 0x1d7   : > { %2815 = vmatpush1.bf16.msra.mxu1 %v3890_v60  ;;  %2644 = vmatprep.subr.bf16.mxu0 %v3895_v61 }
 0x1d8   : > { %2816 = vmatprep.subr.bf16.mxu1 %v3898_v62 }
 0x1da   : > { %2645 = vmatpush1.bf16.msra.mxu0 %v3893_v63 }
 0x1db   : > { %2817 = vmatpush1.bf16.msra.mxu1 %v3896_v0  ;;  %2646 = vmatprep.subr.bf16.mxu0 %v3901_v3  ;;  %v2958_v3 = vpop.permute.xlu1 %2957 }
 0x1dc   : > { %2818 = vmatprep.subr.bf16.mxu1 %v3904_v4 }
 0x1de   : > { %2647 = vmatpush1.bf16.msra.mxu0 %v3899_v5 }
 0x1df   : > { %2819 = vmatpush1.bf16.msra.mxu1 %v3902_v6  ;;  %2648 = vmatprep.subr.bf16.mxu0 %v3907_v8 }
 0x1e0   : > { %2820 = vmatprep.subr.bf16.mxu1 %v3910_v9 }
 0x1e2   : > { %2649 = vmatpush1.bf16.msra.mxu0 %v3905_v10  ;;  %v1210_v10 = vld [vmem:[%s5080_s8 + $0x28] sm:$0xff] }
 0x1e3   : > { %2821 = vmatpush1.bf16.msra.mxu1 %v3908_v12  ;;  %2650 = vmatprep.subr.bf16.mxu0 %v3913_v13  ;;  %v1212_v12 = vld [vmem:[%s5080_s8 + $0x38] sm:$0xff] }
 0x1e4   : > { %2822 = vmatprep.subr.bf16.mxu1 %v3916_v38 }
 0x1e6   : > { %2651 = vmatpush1.bf16.msra.mxu0 %v3911_v47 }
 0x1e7   : > { %2823 = vmatpush1.bf16.msra.mxu1 %v3914_v14  ;;  %2652 = vmatprep.subr.bf16.mxu0 %v3919_v15  ;;  %v2922_v15 = vpop.permute.xlu0 %2921 }
 0x1e8   : > { %2824 = vmatprep.subr.bf16.mxu1 %v3922_v43 }
 0x1ea   : > { %2653 = vmatpush1.bf16.msra.mxu0 %v3917_v16 }
 0x1eb   : > { %2825 = vmatpush1.bf16.msra.mxu1 %v3920_v17 }
 0x1ed   : > { %2655 = vmatmul.mubr.bf16.vlgmr.msra.gmra.mrb[0].mxu0 %v4862_v45 }
 0x1ee   : > { %2827 = vmatmul.mubr.bf16.vlgmr.msra.gmra.mrb[0].mxu1 %v4862_v45  ;;  %v1208_v45 = vld [vmem:[%s5080_s8 + $0x18] sm:$0xff] }
 0x2c0   : > { %v2656_v31 = vpop.f32.mrb[0].mxu0 }
 0x2c1   : > { %v3470_v33 = vadd.f32 %v2656_v31, %v1205_v22  ;;  %v2828_v35 = vpop.f32.mrb[0].mxu1  ;;  %v2658_v37 = vpop.f32.mrb[1].mxu0  ;;  %v2913_v31 = vmul.f32 %v5077_v18, %v4911_v11 }
 0x2c2   : > { %v3474_v40 = vadd.f32 %v2828_v35, %v1207_v25  ;;  %v3471_v41 = vadd.f32 %v2658_v37, %v1206_v28  ;;  %v2830_v49 = vpop.f32.mrb[1].mxu1  ;;  %v2660_v20 = vpop.f32.mrb[2].mxu0  ;;  %v2912_v28 = vmul.f32 %v5077_v18, %v4898_v2 }
 0x2c3   : > { %v3450_v51 = vclamps-f32 %v3470_v33, 20.0  ;;  %v2940_v27 = vsub.f32 %v3470_v33, %v4833_v19  ;;  %v3475_v53 = vadd.f32 %v2830_v49, %v1208_v45  ;;  %v3472_v55 = vadd.f32 %v2660_v20, %v1209_v32  ;;  %v2832_v57 = vpop.f32.mrb[2].mxu1  ;;  %v2662_v23 = vpop.f32.mrb[3].mxu0 }
 0x2c4   : > { %v3452_v39 = vclamps-f32 %v3474_v40, 20.0  ;;  %v2942_v24 = vsub.f32 %v3474_v40, %v4840_v26  ;;  %v3451_v46 = vclamps-f32 %v3471_v41, 20.0  ;;  %v2941_v60 = vsub.f32 %v3471_v41, %v4845_v30  ;;  %v2834_v54 = vpop.f32.mrb[3].mxu1  ;;  %v1211_v30 = vld [vmem:[%s5080_s8 + $0x30] sm:$0xff] }
 0x2c5   : > { %v2924_v61 = vmul.f32 %v3450_v51, %v2918_v29  ;;  %v2948_v59 = vmul.f32 %v2940_v27, %v2940_v27  ;;  %v3453_v62 = vclamps-f32 %v3475_v53, 20.0  ;;  %v2943_v63 = vsub.f32 %v3475_v53, %v4860_v44 }
 0x2c6   : > { %v2926_v19 = vmul.f32 %v3452_v39, %v2918_v29  ;;  %v2950_v0 = vmul.f32 %v2942_v24, %v2942_v24  ;;  %v2925_v4 = vmul.f32 %v3451_v46, %v2918_v29  ;;  %v2949_v5 = vmul.f32 %v2941_v60, %v2941_v60 }
 0x2c7   : > { %v2932_v26 = vsub.f32 %v2908_v34, %v2924_v61  ;;  %v2964_v6 = vmul.f32 %v2958_v3, %v2948_v59  ;;  %v2927_v8 = vmul.f32 %v3453_v62, %v2918_v29  ;;  %v2951_v9 = vmul.f32 %v2943_v63, %v2943_v63 }
 0x2c8   : > { %v2934_v13 = vsub.f32 %v2910_v36, %v2926_v19  ;;  %v2966_v38 = vmul.f32 %v2958_v3, %v2950_v0  ;;  %v2933_v47 = vsub.f32 %v2909_v42, %v2925_v4  ;;  %v2965_v14 = vmul.f32 %v2958_v3, %v2949_v5  ;;  %v2962_v36 = vpop.permute.xlu1 %2961 }
 0x2c9   : > { %2972 = vst [vmem:[%s5099_s21] sm:$0xff] %v2932_v26  ;;  %2980 = vst [vmem:[%s5103_s29] sm:$0xff] %v2964_v6  ;;  %v2935_v44 = vsub.f32 %v2911_v50, %v2927_v8  ;;  %v2967_v43 = vmul.f32 %v2958_v3, %v2951_v9  ;;  %v3454_v16 = vclamps-f32 %v3472_v55, 20.0  ;;  %v2944_v17 = vsub.f32 %v3472_v55, %v4871_v52 }
 0x2ca   : > { %2974 = vst [vmem:[%s5099_s21 + $0x10] sm:$0xff] %v2934_v13  ;;  %2982 = vst [vmem:[%s5103_s29 + $0x10] sm:$0xff] %v2966_v38  ;;  %v3476_v21 = vadd.f32 %v2832_v57, %v1211_v30  ;;  %v3473_v22 = vadd.f32 %v2662_v23, %v1210_v10  ;;  %v3477_v25 = vadd.f32 %v2834_v54, %v1212_v12 }
 0x2cb   : > { %2973 = vst [vmem:[%s5099_s21 + $0x8] sm:$0xff] %v2933_v47  ;;  %2981 = vst [vmem:[%s5103_s29 + $0x8] sm:$0xff] %v2965_v14  ;;  %v2952_v29 = vmul.f32 %v2944_v17, %v2944_v17  ;;  %v2914_v45 = vmul.f32 %v5077_v18, %v4905_v7  ;;  %v2928_v52 = vmul.f32 %v3454_v16, %v2922_v15 }
 0x2cc   : > { %2975 = vst [vmem:[%s5099_s21 + $0x18] sm:$0xff] %v2935_v44  ;;  %2983 = vst [vmem:[%s5103_s29 + $0x18] sm:$0xff] %v2967_v43  ;;  %v3456_v32 = vclamps-f32 %v3476_v21, 20.0  ;;  %v2946_v33 = vsub.f32 %v3476_v21, %v4878_v56  ;;  %v3455_v34 = vclamps-f32 %v3473_v22, 20.0  ;;  %v2945_v35 = vsub.f32 %v3473_v22, %v4882_v58 }
 0x2cd   : > { %v3457_v2 = vclamps-f32 %v3477_v25, 20.0  ;;  %v2947_v37 = vsub.f32 %v3477_v25, %v4896_v1  ;;  %v2968_v40 = vmul.f32 %v2962_v36, %v2952_v29  ;;  %v2936_v41 = vsub.f32 %v2912_v28, %v2928_v52 }
 0x2ce   : > { %v2954_v11 = vmul.f32 %v2946_v33, %v2946_v33  ;;  %v2953_v42 = vmul.f32 %v2945_v35, %v2945_v35  ;;  %v2929_v7 = vmul.f32 %v3455_v34, %v2922_v15  ;;  %v2930_v49 = vmul.f32 %v3456_v32, %v2922_v15  ;;  %2998 = sbr.rel (!%p4024_p5) target bundleno = 733 (0x2dd), region = 90 }
 0x2cf   : > { %v2955_v56 = vmul.f32 %v2947_v37, %v2947_v37  ;;  %2984 = vst [vmem:[%s5103_s29 + $0x20] sm:$0xff] %v2968_v40  ;;  %v2915_v58 = vmul.f32 %v5077_v18, %v4913_v48  ;;  %v2931_v50 = vmul.f32 %v3457_v2, %v2922_v15  ;;  %2976 = vst [vmem:[%s5099_s21 + $0x20] sm:$0xff] %v2936_v41 }
 0x2d0   : > { %v2969_v1 = vmul.f32 %v2962_v36, %v2953_v42  ;;  %v2970_v20 = vmul.f32 %v2962_v36, %v2954_v11  ;;  %v2937_v51 = vsub.f32 %v2913_v31, %v2929_v7  ;;  %v2938_v27 = vsub.f32 %v2914_v45, %v2930_v49  ;;  %v3014_v48 = vld [vmem:[%s5099_s21] sm:$0xff] (%p4024_p5) }
 0x2d1   : > { %v2971_v53 = vmul.f32 %v2962_v36, %v2955_v56  ;;  %v2939_v55 = vsub.f32 %v2915_v58, %v2931_v50  ;;  %v3018_v57 = vld [vmem:[%s5099_s21 + $0x10] sm:$0xff] (%p4024_p5)  ;;  %3015 = vst [vmem:[%s3001_s11] sm:$0xff] (%p4024_p5), %v3014_v48 }
 0x2d2   : > { %2985 = vst [vmem:[%s5103_s29 + $0x28] sm:$0xff] %v2969_v1  ;;  %2986 = vst [vmem:[%s5103_s29 + $0x30] sm:$0xff] %v2970_v20  ;;  %v3016_v18 = vld [vmem:[%s5099_s21 + $0x8] sm:$0xff] (%p4024_p5) }
 0x2d3   : > { %2977 = vst [vmem:[%s5099_s21 + $0x28] sm:$0xff] %v2937_v51  ;;  %2978 = vst [vmem:[%s5099_s21 + $0x30] sm:$0xff] %v2938_v27  ;;  %v3020_v23 = vld [vmem:[%s5099_s21 + $0x18] sm:$0xff] (%p4024_p5) }
 0x2d4   : > { %2987 = vst [vmem:[%s5103_s29 + $0x38] sm:$0xff] %v2971_v53  ;;  %2979 = vst [vmem:[%s5099_s21 + $0x38] sm:$0xff] %v2939_v55 }
 0x2d5   : > { %3017 = vst [vmem:[%s3001_s11 + $0x8] sm:$0xff] %v3016_v18  ;;  %3019 = vst [vmem:[%s3001_s11 + $0x10] sm:$0xff] %v3018_v57 }
 0x2d6   : > { %v3022_v39 = vld [vmem:[%s5099_s21 + $0x20] sm:$0xff]  ;;  %3021 = vst [vmem:[%s3001_s11 + $0x18] sm:$0xff] %v3020_v23 }
 0x2d7   : > { %3023 = vst [vmem:[%s3001_s11 + $0x40] sm:$0xff] %v3022_v39 }
 0x2da   : > { %v3024_v24 = vld [vmem:[%s5099_s21 + $0x28] sm:$0xff]  ;;  %v3026_v46 = vld [vmem:[%s5099_s21 + $0x30] sm:$0xff] }
 0x2db   : > { %3025 = vst [vmem:[%s3001_s11 + $0x48] sm:$0xff] %v3024_v24  ;;  %v3028_v60 = vld [vmem:[%s5099_s21 + $0x38] sm:$0xff]  ;;  %3027 = vst [vmem:[%s3001_s11 + $0x50] sm:$0xff] %v3026_v46 }
 0x2dc   : > { %3029 = vst [vmem:[%s3001_s11 + $0x58] sm:$0xff] %v3028_v60 }
 0x2dd PF: > { %3035 = sbr.rel (!%p4024_p5) target bundleno = 741 (0x2e5), region = 113  ;;  %s3469_s12 = sshll.u32 (%p4024_p5), %s4005_s24, 5  ;;  %v3051_v54 = vld [vmem:[%s5103_s29] sm:$0xff] (%p4024_p5)  ;;  %v3053_v61 = vld [vmem:[%s5103_s29 + $0x8] sm:$0xff] (%p4024_p5)  ;;  %v3055_v59 = vld [vmem:[%s5103_s29 + $0x10] sm:$0xff] (%p4024_p5) }
 0x2de   : > { %s3038_s15 = scalar_lea.vmem (%p4024_p5), %s5176_s6, %s3469_s12  ;;  %v3057_v62 = vld [vmem:[%s5103_s29 + $0x18] sm:$0xff] (%p4024_p5)  ;;  %v3059_v63 = vld [vmem:[%s5103_s29 + $0x20] sm:$0xff] (%p4024_p5) }
 0x2df   : > { %3052 = vst [vmem:[%s3038_s15] sm:$0xff] (%p4024_p5), %v3051_v54  ;;  %3054 = vst [vmem:[%s3038_s15 + $0x8] sm:$0xff] (%p4024_p5), %v3053_v61 }
 0x2e0   : > { %3056 = vst [vmem:[%s3038_s15 + $0x10] sm:$0xff] (%p4024_p5), %v3055_v59  ;;  %3058 = vst [vmem:[%s3038_s15 + $0x18] sm:$0xff] (%p4024_p5), %v3057_v62 }
 0x2e1   : > { %v3061_v19 = vld [vmem:[%s5103_s29 + $0x28] sm:$0xff] (%p4024_p5)  ;;  %3060 = vst [vmem:[%s3038_s15 + $0x40] sm:$0xff] (%p4024_p5), %v3059_v63  ;;  %v3063_v0 = vld [vmem:[%s5103_s29 + $0x30] sm:$0xff] (%p4024_p5) }
 0x2e2   : > { %3062 = vst [vmem:[%s3038_s15 + $0x48] sm:$0xff] (%p4024_p5), %v3061_v19  ;;  %3064 = vst [vmem:[%s3038_s15 + $0x50] sm:$0xff] (%p4024_p5), %v3063_v0 }
 0x2e3   : > { %v3065_v3 = vld [vmem:[%s5103_s29 + $0x38] sm:$0xff] (%p4024_p5) }
 0x2e4   : > { %3066 = vst [vmem:[%s3038_s15 + $0x58] sm:$0xff] %v3065_v3 }
 0x2e5 PF: > { %p14_p10 = scmp.ge.s32.totalorder %s4008_s25, 4   ;;  %s5179_s21 = smov %s3943_s22 }
 0x2e6   : > { %s5180_s22 = smov %s4018_s28  ;;  %s5181_s23 = smov %s4008_s25 }
 0x2e7   :  { %16 = sbr.rel (!%p14_p10) target bundleno = 2 (0x2), region = 189 }

</bundles_post_ra>
